<compile_context>
chip_gen: v7x
topology: tpu7x:2x2x1
jax: 0.10.0
libtpu: 0.0.40
codegen_flags: <defaults>
</compile_context>

<pallas_src>
import functools
import math

import jax
import jax.numpy as jnp
from jax.experimental import pallas as pl
from jax.experimental.pallas import tpu as pltpu


def _gru_recurrent_kernel(gi_ref, bi_ref, bhn_ref, whh_hbm_ref, out_ref,
                          h_ref, whh_vmem, *, t_chunk, hidden, unroll,
                          last_layer, nt):
    """Recurrent part of one GRU layer for one chunk of time steps.

    gi_ref:      (T_CHUNK, TB, 3H) bf16  precomputed x @ W_ih (no bias), gate order r,z,n
    bi_ref:      (1, 3H)  f32            b_ih (+ b_hh folded in for the r,z gates)
    bhn_ref:     (1, H)   f32            b_hh_n (must stay inside the r* term)
    whh_hbm_ref: (H, 3H)  bf16 (ANY)     hidden->hidden weights, staged once to VMEM
    out_ref:     (T_CHUNK, TB, H) bf16   per-step hidden states   (intermediate layer)
                 (TB, H)        f32      final hidden state        (top layer)
    h_ref:       (TB, H)  f32  scratch   h_{t-1} carry across grid steps
    whh_vmem:    (H, 3H)  bf16 scratch   resident single-buffered W_hh copy
    """
    t = pl.program_id(1)

    @pl.when(t == 0)
    def _():
        # Per-batch-block init: reset the carry and stage W_hh into VMEM exactly once
        # (avoids the default double-buffering a resident-weight BlockSpec would get).
        h_ref[...] = jnp.zeros_like(h_ref)
        pltpu.sync_copy(whh_hbm_ref, whh_vmem)

    w_hh = whh_vmem[...]                 # (H, 3H) bf16, resident for the whole block
    bias_i = bi_ref[...]                 # (1, 3H) f32
    bias_hn = bhn_ref[...]               # (1, H)  f32

    def step(i, h):
        gi_t = gi_ref[i].astype(jnp.float32) + bias_i             # (TB, 3H) f32
        # Single fused hidden-side matmul (bf16 in, f32 accumulate).
        gh = jnp.dot(h.astype(jnp.bfloat16), w_hh,
                     preferred_element_type=jnp.float32)          # (TB, 3H) f32
        # r and z in one (TB, 2H) VPU/EUP pass.
        rz = jax.nn.sigmoid(gi_t[:, :2 * hidden] + gh[:, :2 * hidden])
        r = rz[:, :hidden]
        z = rz[:, hidden:]
        n = jnp.tanh(gi_t[:, 2 * hidden:] + r * (gh[:, 2 * hidden:] + bias_hn))
        h_new = n + z * (h - n)          # == (1 - z) * n + z * h, one fewer VPU pass
        if not last_layer:
            out_ref[i] = h_new.astype(out_ref.dtype)
        return h_new

    h_final = jax.lax.fori_loop(0, t_chunk, step, h_ref[...], unroll=unroll)
    h_ref[...] = h_final

    if last_layer:
        # Only the final hidden state of the top layer leaves the chip.
        @pl.when(t == nt - 1)
        def _():
            out_ref[...] = h_final.astype(out_ref.dtype)


def _tpu_layout_info():
    """(num_tensorcores_per_chip, physical_vmem_bytes) with conservative fallbacks."""
    vmem_bytes = 64 * 1024 * 1024
    num_cores = 1
    try:
        vmem_bytes = int(pltpu.get_tpu_info().vmem_capacity_bytes)
    except Exception:
        pass
    try:
        kind = jax.devices()[0].device_kind.lower()
        if "v7" in kind:                 # v7x: 2 TensorCores per chip
            num_cores = 2
    except Exception:
        pass
    return num_cores, vmem_bytes


def _pick_time_chunk(seq_len, tb, hidden, seq_out_bytes, whh_bytes, budget_bytes):
    """Largest divisor of seq_len whose double-buffered GI + seq-out blocks plus the
    resident W_hh copy (and a fixed margin) fit the per-generation VMEM budget."""
    gi_bytes = 2                         # GI streamed as bf16
    margin = 2 * 1024 * 1024             # compiler scratch / carry / bias headroom
    best = 1
    for c in range(1, min(seq_len, 256) + 1):
        if seq_len % c:
            continue
        need = (2 * c * tb * 3 * hidden * gi_bytes
                + 2 * c * tb * hidden * seq_out_bytes
                + whh_bytes + margin)
        if need <= budget_bytes:
            best = c
    return best


def gru_layer_pallas(x_seq, w_ih, w_hh, b_ih, b_hh, *, last_layer):
    """One GRU layer over the full sequence.

    x_seq: (S, B, I).  Weight layout (pre-transposed vs PyTorch): w_ih (I, 3H),
    w_hh (H, 3H), b_ih/b_hh (3H,), gate order (r, z, n) along the 3H axis.
    Returns (S, B, H) bf16 if not last_layer, else (B, H) f32 (the final step).
    """
    S, B, _ = x_seq.shape
    H = w_hh.shape[0]

    w_ih_bf = w_ih.astype(jnp.bfloat16)
    w_hh_bf = w_hh.astype(jnp.bfloat16)

    # Pre-fuse r/z biases (b_ih + b_hh); keep b_hh_n separate for the r* term.
    bias_i = (b_ih + jnp.concatenate([b_hh[:2 * H], jnp.zeros((H,), b_hh.dtype)])
              ).reshape(1, 3 * H).astype(jnp.float32)
    bias_hn = b_hh[2 * H:].reshape(1, H).astype(jnp.float32)

    num_cores, vmem_phys = _tpu_layout_info()

    # Batch split only on 2-TensorCore chips and only when both halves stay
    # sublane-aligned; on v5e/v6e splitting would halve MXU row parallelism.
    nb = 2 if (num_cores >= 2 and B % 2 == 0 and (B // 2) % 8 == 0) else 1
    tb = B // nb

    whh_bytes = H * 3 * H * 2            # single-buffered resident bf16 copy
    seq_out_bytes = 0 if last_layer else 2
    t_chunk = _pick_time_chunk(S, tb, H, seq_out_bytes, whh_bytes,
                               int(vmem_phys * 0.75))
    nt = S // t_chunk

    # Bounded unroll: full unroll only while a (TB, 3H) f32 per-step intermediate fits
    # in a handful of vregs; otherwise cap it to avoid spilling the 64-entry vreg file.
    step_vregs = -(-tb // 8) * -(-(3 * H) // 128)
    unroll = t_chunk if step_vregs <= 8 else min(t_chunk, 4)
    unroll_arg = True if unroll >= t_chunk else unroll

    # Input projection hoisted out of the recurrence: one big bf16 GEMM, GI kept bf16.
    # With nb > 1 the batch-block axis is made leading so every (t_chunk, tb, 3H)
    # block is a contiguous HBM slab (no strided per-row DMA descriptors).
    x_bf = x_seq.astype(jnp.bfloat16)
    if nb > 1:
        x_r = x_bf.reshape(S, nb, tb, -1).transpose(1, 0, 2, 3)       # (nb, S, tb, I)
        gi = jnp.einsum("nsbi,ik->nsbk", x_r, w_ih_bf,
                        preferred_element_type=jnp.float32)
        gi = gi.astype(jnp.bfloat16).reshape(nb * S, tb, 3 * H)
    else:
        gi = jnp.einsum("sbi,ik->sbk", x_bf, w_ih_bf,
                        preferred_element_type=jnp.float32).astype(jnp.bfloat16)
        # (S, B, 3H) == (nb*S, tb, 3H) when nb == 1

    if last_layer:
        out_shape = jax.ShapeDtypeStruct((B, H), jnp.float32)
        out_spec = pl.BlockSpec((tb, H), lambda b, t: (b, 0))
    else:
        out_shape = jax.ShapeDtypeStruct((nb * S, tb, H), jnp.bfloat16)
        out_spec = pl.BlockSpec((t_chunk, tb, H), lambda b, t: (b * nt + t, 0, 0))

    grid_spec = pltpu.PrefetchScalarGridSpec(
        num_scalar_prefetch=0,
        # Time (the recurrence) MUST stay the innermost, in-order grid axis: the h
        # carry scratch and the pl.when(t == 0) reset per batch block depend on it.
        grid=(nb, nt),
        in_specs=[
            pl.BlockSpec((t_chunk, tb, 3 * H), lambda b, t: (b * nt + t, 0, 0)),  # GI
            pl.BlockSpec((1, 3 * H), lambda b, t: (0, 0)),                        # bias_i
            pl.BlockSpec((1, H), lambda b, t: (0, 0)),                            # b_hh_n
            pl.BlockSpec(memory_space=pl.ANY),                                    # W_hh (HBM)
        ],
        out_specs=out_spec,
        scratch_shapes=[
            pltpu.VMEM((tb, H), jnp.float32),            # h carry
            pltpu.VMEM((H, 3 * H), jnp.bfloat16),        # resident single-buffered W_hh
        ],
    )

    kernel = functools.partial(
        _gru_recurrent_kernel,
        t_chunk=t_chunk, hidden=H, unroll=unroll_arg, last_layer=last_layer, nt=nt)

    batch_sem = pltpu.CORE_PARALLEL if nb > 1 else "arbitrary"

    out = pl.pallas_call(
        kernel,
        out_shape=out_shape,
        grid_spec=grid_spec,
        compiler_params=pltpu.CompilerParams(
            dimension_semantics=(batch_sem, "arbitrary"),
            vmem_limit_bytes=int(vmem_phys * 0.85),      # per-generation, with headroom
        ),
    )(gi, bias_i, bias_hn, w_hh_bf)

    if last_layer:
        return out                                       # (B, H) f32
    if nb > 1:
        out = out.reshape(nb, S, tb, H).transpose(1, 0, 2, 3).reshape(S, B, H)
    return out                                           # (S, B, H) bf16


@jax.jit
def gru_forward(x, params):
    """Multi-layer GRU; returns out[-1] just like the PyTorch module."""
    # TODO(synk): for deep stacks, fuse consecutive layers (wavefront over layer/time)
    # to avoid the per-layer (S,B,H) HBM round-trip.
    h_seq = x
    n_layers = len(params)
    for li, (w_ih, w_hh, b_ih, b_hh) in enumerate(params):
        h_seq = gru_layer_pallas(h_seq, w_ih, w_hh, b_ih, b_hh,
                                 last_layer=(li == n_layers - 1))
    return h_seq                                         # (B, H) final top-layer state


def init_gru_params(key, input_size, hidden_size, num_layers):
    """Deterministic init matching PyTorch nn.GRU (uniform(-1/sqrt(H), 1/sqrt(H))).

    Weights stored pre-transposed for x @ W: (in_dim, 3H), gate order (r, z, n).
    """
    params = []
    bound = 1.0 / math.sqrt(hidden_size)
    for layer in range(num_layers):
        in_dim = input_size if layer == 0 else hidden_size
        key, k1, k2, k3, k4 = jax.random.split(key, 5)
        w_ih = jax.random.uniform(k1, (in_dim, 3 * hidden_size), jnp.float32, -bound, bound)
        w_hh = jax.random.uniform(k2, (hidden_size, 3 * hidden_size), jnp.float32, -bound, bound)
        b_ih = jax.random.uniform(k3, (3 * hidden_size,), jnp.float32, -bound, bound)
        b_hh = jax.random.uniform(k4, (3 * hidden_size,), jnp.float32, -bound, bound)
        params.append((w_ih, w_hh, b_ih, b_hh))
    return params


def gru_forward_ref(x, params):
    """Pure-JAX reference (lax.scan) mirroring the kernel's bf16/f32 split exactly."""
    h_seq = x
    n_layers = len(params)
    for li, (w_ih, w_hh, b_ih, b_hh) in enumerate(params):
        B = h_seq.shape[1]
        H = w_hh.shape[0]
        gi_all = jnp.einsum("sbi,ik->sbk", h_seq.astype(jnp.bfloat16),
                            w_ih.astype(jnp.bfloat16),
                            preferred_element_type=jnp.float32).astype(jnp.bfloat16)
        bias_i = b_ih + jnp.concatenate([b_hh[:2 * H], jnp.zeros((H,), b_hh.dtype)])
        b_hh_n = b_hh[2 * H:]
        w_hh_bf = w_hh.astype(jnp.bfloat16)

        def step(h, gi_t, bias_i=bias_i, b_hh_n=b_hh_n, w_hh_bf=w_hh_bf, H=H):
            gi = gi_t.astype(jnp.float32) + bias_i
            gh = jnp.dot(h.astype(jnp.bfloat16), w_hh_bf,
                         preferred_element_type=jnp.float32)
            r = jax.nn.sigmoid(gi[:, :H] + gh[:, :H])
            z = jax.nn.sigmoid(gi[:, H:2 * H] + gh[:, H:2 * H])
            n = jnp.tanh(gi[:, 2 * H:] + r * (gh[:, 2 * H:] + b_hh_n))
            h_new = n + z * (h - n)
            return h_new, h_new

        h0 = jnp.zeros((B, H), jnp.float32)
        h_last, seq = jax.lax.scan(step, h0, gi_all)
        h_seq = h_last if li == n_layers - 1 else seq.astype(jnp.bfloat16)
    return h_seq


if __name__ == "__main__":
    seq_len = 8
    batch = 4
    input_size = 16
    hidden_size = 32
    num_layers = 2

    key = jax.random.PRNGKey(0)
    key, kx = jax.random.split(key)
    # x layout: (seq, batch, input_size) — PyTorch batch_first=False convention.
    x = jax.random.normal(kx, (seq_len, batch, input_size), jnp.float32)

    params = init_gru_params(key, input_size, hidden_size, num_layers)

    out = jax.block_until_ready(gru_forward(x, params))
    ref = jax.block_until_ready(gru_forward_ref(x, params))

    assert out.shape == (batch, hidden_size)
    max_err = float(jnp.max(jnp.abs(out - ref)))
    assert jnp.allclose(out, ref, atol=2e-3, rtol=2e-3), f"mismatch vs reference, max abs err={max_err}"

    print("KERNEL_OK")
</pallas_src>

<mosaic_0001>
module attributes {stable_mosaic.version = 11 : i64} {
  func.func @_gru_recurrent_kernel(%arg0: i32, %arg1: i32, %arg2: memref<8x4x96xbf16, #tpu.memory_space<vmem>>, %arg3: memref<1x96xf32, #tpu.memory_space<vmem>>, %arg4: memref<1x32xf32, #tpu.memory_space<vmem>>, %arg5: memref<32x96xbf16, #tpu.memory_space<any>>, %arg6: memref<4x32xf32, #tpu.memory_space<vmem>>, %arg7: memref<4x32xf32, #tpu.memory_space<vmem>>, %arg8: memref<32x96xbf16, #tpu.memory_space<vmem>>) attributes {dimension_semantics = [#tpu.dimension_semantics<arbitrary>, #tpu.dimension_semantics<arbitrary>], iteration_bounds = array<i64: 1, 1>, scalar_prefetch = 0 : i64, scratch_operands = 2 : i64, tpu.core_type = #tpu.core_type<tc>, window_params = [{transform_indices = @transform_0, window_bounds = array<i64: 8, 4, 96>}, {pipeline_mode = #tpu.pipeline_mode<synchronous>, transform_indices = @transform_1, window_bounds = array<i64: 1, 96>}, {pipeline_mode = #tpu.pipeline_mode<synchronous>, transform_indices = @transform_2, window_bounds = array<i64: 1, 32>}, {}, {transform_indices = @transform_4, window_bounds = array<i64: 4, 32>}]} {
    %c0_i32 = arith.constant 0 : i32
    %0 = arith.cmpi eq, %arg1, %c0_i32 : i32
    %1 = arith.extui %0 : i1 to i32
    %c0_i32_0 = arith.constant 0 : i32
    %2 = arith.cmpi ne, %1, %c0_i32_0 : i32
    scf.if %2 {
      %cst_44 = arith.constant 0.000000e+00 : f32
      %235 = vector.broadcast %cst_44 : f32 to vector<4x32xf32>
      %c0_45 = arith.constant 0 : index
      %c0_46 = arith.constant 0 : index
      %236 = vector.load %arg7[%c0_45, %c0_46] : memref<4x32xf32, #tpu.memory_space<vmem>>, vector<4x32xf32>
      tpu.vector_store %arg7[%c0_45, %c0_46], %235 {strides = array<i32>} : memref<4x32xf32, #tpu.memory_space<vmem>>, vector<4x32xf32>,
      "tpu.region"() ({
        %237 = tpu.sem_alloc : memref<!tpu.dma_semaphore, #tpu.memory_space<semaphore_mem>>
        tpu.enqueue_dma source(%arg5 : memref<32x96xbf16, #tpu.memory_space<any>>) target(%arg8 : memref<32x96xbf16, #tpu.memory_space<vmem>>) target_semaphore(%237 : memref<!tpu.dma_semaphore, #tpu.memory_space<semaphore_mem>>)
        tpu.wait_dma2 semaphore(%237 : memref<!tpu.dma_semaphore, #tpu.memory_space<semaphore_mem>>) src(%arg5 : memref<32x96xbf16, #tpu.memory_space<any>>) dst(%arg8 : memref<32x96xbf16, #tpu.memory_space<vmem>>)
        tpu.yield
      }) : () -> ()
    } else {
    }
    %c0 = arith.constant 0 : index
    %c0_1 = arith.constant 0 : index
    %3 = vector.load %arg8[%c0, %c0_1] : memref<32x96xbf16, #tpu.memory_space<vmem>>, vector<32x96xbf16>
    %c0_2 = arith.constant 0 : index
    %c0_3 = arith.constant 0 : index
    %4 = vector.load %arg3[%c0_2, %c0_3] : memref<1x96xf32, #tpu.memory_space<vmem>>, vector<1x96xf32>
    %c0_4 = arith.constant 0 : index
    %c0_5 = arith.constant 0 : index
    %5 = vector.load %arg4[%c0_4, %c0_5] : memref<1x32xf32, #tpu.memory_space<vmem>>, vector<1x32xf32>
    %c0_6 = arith.constant 0 : index
    %c0_7 = arith.constant 0 : index
    %6 = vector.load %arg7[%c0_6, %c0_7] : memref<4x32xf32, #tpu.memory_space<vmem>>, vector<4x32xf32>
    %c0_i32_8 = arith.constant 0 : i32
    %7 = arith.index_cast %c0_i32_8 : i32 to index
    %c0_9 = arith.constant 0 : index
    %c0_10 = arith.constant 0 : index
    %8 = vector.load %arg2[%7, %c0_9, %c0_10] : memref<8x4x96xbf16, #tpu.memory_space<vmem>>, vector<1x4x96xbf16>
    %9 = vector.shape_cast %8 : vector<1x4x96xbf16> to vector<4x96xbf16>
    %10 = arith.extf %9 : vector<4x96xbf16> to vector<4x96xf32>
    %11 = vector.broadcast %4 : vector<1x96xf32> to vector<4x96xf32>
    %12 = arith.addf %10, %11 : vector<4x96xf32>
    %13 = arith.truncf %6 : vector<4x32xf32> to vector<4x32xbf16>
    %cst = arith.constant dense<0.000000e+00> : vector<4x96xf32>
    %14 = tpu.matmul %13, %3, %cst {dimension_numbers = #tpu.dot_dimension_numbers<[1], [0], [0], [1], [0, 0, 1, 1], [], []>} : vector<4x32xbf16>, vector<32x96xbf16>, vector<4x96xf32> -> vector<4x96xf32>
    %15 = vector.extract_strided_slice %12 {offsets = [0, 0], sizes = [4, 64], strides = [1, 1]} : vector<4x96xf32> to vector<4x64xf32>
    %16 = vector.extract_strided_slice %14 {offsets = [0, 0], sizes = [4, 64], strides = [1, 1]} : vector<4x96xf32> to vector<4x64xf32>
    %17 = arith.addf %15, %16 : vector<4x64xf32>
    %18 = arith.negf %17 : vector<4x64xf32>
    %19 = math.exp %18 : vector<4x64xf32>
    %cst_11 = arith.constant 1.000000e+00 : f32
    %20 = vector.broadcast %cst_11 : f32 to vector<4x64xf32>
    %21 = arith.addf %20, %19 : vector<4x64xf32>
    %22 = arith.divf %20, %21 : vector<4x64xf32>
    %23 = vector.extract_strided_slice %22 {offsets = [0, 0], sizes = [4, 32], strides = [1, 1]} : vector<4x64xf32> to vector<4x32xf32>
    %24 = vector.extract_strided_slice %22 {offsets = [0, 32], sizes = [4, 32], strides = [1, 1]} : vector<4x64xf32> to vector<4x32xf32>
    %25 = vector.extract_strided_slice %12 {offsets = [0, 64], sizes = [4, 32], strides = [1, 1]} : vector<4x96xf32> to vector<4x32xf32>
    %26 = vector.extract_strided_slice %14 {offsets = [0, 64], sizes = [4, 32], strides = [1, 1]} : vector<4x96xf32> to vector<4x32xf32>
    %27 = vector.broadcast %5 : vector<1x32xf32> to vector<4x32xf32>
    %28 = arith.addf %26, %27 : vector<4x32xf32>
    %29 = arith.mulf %23, %28 : vector<4x32xf32>
    %30 = arith.addf %25, %29 : vector<4x32xf32>
    %31 = math.tanh %30 : vector<4x32xf32>
    %32 = arith.subf %6, %31 : vector<4x32xf32>
    %33 = arith.mulf %24, %32 : vector<4x32xf32>
    %34 = arith.addf %31, %33 : vector<4x32xf32>
    %c1_i32 = arith.constant 1 : i32
    %35 = arith.index_cast %c1_i32 : i32 to index
    %c0_12 = arith.constant 0 : index
    %c0_13 = arith.constant 0 : index
    %36 = vector.load %arg2[%35, %c0_12, %c0_13] : memref<8x4x96xbf16, #tpu.memory_space<vmem>>, vector<1x4x96xbf16>
    %37 = vector.shape_cast %36 : vector<1x4x96xbf16> to vector<4x96xbf16>
    %38 = arith.extf %37 : vector<4x96xbf16> to vector<4x96xf32>
    %39 = vector.broadcast %4 : vector<1x96xf32> to vector<4x96xf32>
    %40 = arith.addf %38, %39 : vector<4x96xf32>
    %41 = arith.truncf %34 : vector<4x32xf32> to vector<4x32xbf16>
    %cst_14 = arith.constant dense<0.000000e+00> : vector<4x96xf32>
    %42 = tpu.matmul %41, %3, %cst_14 {dimension_numbers = #tpu.dot_dimension_numbers<[1], [0], [0], [1], [0, 0, 1, 1], [], []>} : vector<4x32xbf16>, vector<32x96xbf16>, vector<4x96xf32> -> vector<4x96xf32>
    %43 = vector.extract_strided_slice %40 {offsets = [0, 0], sizes = [4, 64], strides = [1, 1]} : vector<4x96xf32> to vector<4x64xf32>
    %44 = vector.extract_strided_slice %42 {offsets = [0, 0], sizes = [4, 64], strides = [1, 1]} : vector<4x96xf32> to vector<4x64xf32>
    %45 = arith.addf %43, %44 : vector<4x64xf32>
    %46 = arith.negf %45 : vector<4x64xf32>
    %47 = math.exp %46 : vector<4x64xf32>
    %cst_15 = arith.constant 1.000000e+00 : f32
    %48 = vector.broadcast %cst_15 : f32 to vector<4x64xf32>
    %49 = arith.addf %48, %47 : vector<4x64xf32>
    %50 = arith.divf %48, %49 : vector<4x64xf32>
    %51 = vector.extract_strided_slice %50 {offsets = [0, 0], sizes = [4, 32], strides = [1, 1]} : vector<4x64xf32> to vector<4x32xf32>
    %52 = vector.extract_strided_slice %50 {offsets = [0, 32], sizes = [4, 32], strides = [1, 1]} : vector<4x64xf32> to vector<4x32xf32>
    %53 = vector.extract_strided_slice %40 {offsets = [0, 64], sizes = [4, 32], strides = [1, 1]} : vector<4x96xf32> to vector<4x32xf32>
    %54 = vector.extract_strided_slice %42 {offsets = [0, 64], sizes = [4, 32], strides = [1, 1]} : vector<4x96xf32> to vector<4x32xf32>
    %55 = vector.broadcast %5 : vector<1x32xf32> to vector<4x32xf32>
    %56 = arith.addf %54, %55 : vector<4x32xf32>
    %57 = arith.mulf %51, %56 : vector<4x32xf32>
    %58 = arith.addf %53, %57 : vector<4x32xf32>
    %59 = math.tanh %58 : vector<4x32xf32>
    %60 = arith.subf %34, %59 : vector<4x32xf32>
    %61 = arith.mulf %52, %60 : vector<4x32xf32>
    %62 = arith.addf %59, %61 : vector<4x32xf32>
    %c2_i32 = arith.constant 2 : i32
    %63 = arith.index_cast %c2_i32 : i32 to index
    %c0_16 = arith.constant 0 : index
    %c0_17 = arith.constant 0 : index
    %64 = vector.load %arg2[%63, %c0_16, %c0_17] : memref<8x4x96xbf16, #tpu.memory_space<vmem>>, vector<1x4x96xbf16>
    %65 = vector.shape_cast %64 : vector<1x4x96xbf16> to vector<4x96xbf16>
    %66 = arith.extf %65 : vector<4x96xbf16> to vector<4x96xf32>
    %67 = vector.broadcast %4 : vector<1x96xf32> to vector<4x96xf32>
    %68 = arith.addf %66, %67 : vector<4x96xf32>
    %69 = arith.truncf %62 : vector<4x32xf32> to vector<4x32xbf16>
    %cst_18 = arith.constant dense<0.000000e+00> : vector<4x96xf32>
    %70 = tpu.matmul %69, %3, %cst_18 {dimension_numbers = #tpu.dot_dimension_numbers<[1], [0], [0], [1], [0, 0, 1, 1], [], []>} : vector<4x32xbf16>, vector<32x96xbf16>, vector<4x96xf32> -> vector<4x96xf32>
    %71 = vector.extract_strided_slice %68 {offsets = [0, 0], sizes = [4, 64], strides = [1, 1]} : vector<4x96xf32> to vector<4x64xf32>
    %72 = vector.extract_strided_slice %70 {offsets = [0, 0], sizes = [4, 64], strides = [1, 1]} : vector<4x96xf32> to vector<4x64xf32>
    %73 = arith.addf %71, %72 : vector<4x64xf32>
    %74 = arith.negf %73 : vector<4x64xf32>
    %75 = math.exp %74 : vector<4x64xf32>
    %cst_19 = arith.constant 1.000000e+00 : f32
    %76 = vector.broadcast %cst_19 : f32 to vector<4x64xf32>
    %77 = arith.addf %76, %75 : vector<4x64xf32>
    %78 = arith.divf %76, %77 : vector<4x64xf32>
    %79 = vector.extract_strided_slice %78 {offsets = [0, 0], sizes = [4, 32], strides = [1, 1]} : vector<4x64xf32> to vector<4x32xf32>
    %80 = vector.extract_strided_slice %78 {offsets = [0, 32], sizes = [4, 32], strides = [1, 1]} : vector<4x64xf32> to vector<4x32xf32>
    %81 = vector.extract_strided_slice %68 {offsets = [0, 64], sizes = [4, 32], strides = [1, 1]} : vector<4x96xf32> to vector<4x32xf32>
    %82 = vector.extract_strided_slice %70 {offsets = [0, 64], sizes = [4, 32], strides = [1, 1]} : vector<4x96xf32> to vector<4x32xf32>
    %83 = vector.broadcast %5 : vector<1x32xf32> to vector<4x32xf32>
    %84 = arith.addf %82, %83 : vector<4x32xf32>
    %85 = arith.mulf %79, %84 : vector<4x32xf32>
    %86 = arith.addf %81, %85 : vector<4x32xf32>
    %87 = math.tanh %86 : vector<4x32xf32>
    %88 = arith.subf %62, %87 : vector<4x32xf32>
    %89 = arith.mulf %80, %88 : vector<4x32xf32>
    %90 = arith.addf %87, %89 : vector<4x32xf32>
    %c3_i32 = arith.constant 3 : i32
    %91 = arith.index_cast %c3_i32 : i32 to index
    %c0_20 = arith.constant 0 : index
    %c0_21 = arith.constant 0 : index
    %92 = vector.load %arg2[%91, %c0_20, %c0_21] : memref<8x4x96xbf16, #tpu.memory_space<vmem>>, vector<1x4x96xbf16>
    %93 = vector.shape_cast %92 : vector<1x4x96xbf16> to vector<4x96xbf16>
    %94 = arith.extf %93 : vector<4x96xbf16> to vector<4x96xf32>
    %95 = vector.broadcast %4 : vector<1x96xf32> to vector<4x96xf32>
    %96 = arith.addf %94, %95 : vector<4x96xf32>
    %97 = arith.truncf %90 : vector<4x32xf32> to vector<4x32xbf16>
    %cst_22 = arith.constant dense<0.000000e+00> : vector<4x96xf32>
    %98 = tpu.matmul %97, %3, %cst_22 {dimension_numbers = #tpu.dot_dimension_numbers<[1], [0], [0], [1], [0, 0, 1, 1], [], []>} : vector<4x32xbf16>, vector<32x96xbf16>, vector<4x96xf32> -> vector<4x96xf32>
    %99 = vector.extract_strided_slice %96 {offsets = [0, 0], sizes = [4, 64], strides = [1, 1]} : vector<4x96xf32> to vector<4x64xf32>
    %100 = vector.extract_strided_slice %98 {offsets = [0, 0], sizes = [4, 64], strides = [1, 1]} : vector<4x96xf32> to vector<4x64xf32>
    %101 = arith.addf %99, %100 : vector<4x64xf32>
    %102 = arith.negf %101 : vector<4x64xf32>
    %103 = math.exp %102 : vector<4x64xf32>
    %cst_23 = arith.constant 1.000000e+00 : f32
    %104 = vector.broadcast %cst_23 : f32 to vector<4x64xf32>
    %105 = arith.addf %104, %103 : vector<4x64xf32>
    %106 = arith.divf %104, %105 : vector<4x64xf32>
    %107 = vector.extract_strided_slice %106 {offsets = [0, 0], sizes = [4, 32], strides = [1, 1]} : vector<4x64xf32> to vector<4x32xf32>
    %108 = vector.extract_strided_slice %106 {offsets = [0, 32], sizes = [4, 32], strides = [1, 1]} : vector<4x64xf32> to vector<4x32xf32>
    %109 = vector.extract_strided_slice %96 {offsets = [0, 64], sizes = [4, 32], strides = [1, 1]} : vector<4x96xf32> to vector<4x32xf32>
    %110 = vector.extract_strided_slice %98 {offsets = [0, 64], sizes = [4, 32], strides = [1, 1]} : vector<4x96xf32> to vector<4x32xf32>
    %111 = vector.broadcast %5 : vector<1x32xf32> to vector<4x32xf32>
    %112 = arith.addf %110, %111 : vector<4x32xf32>
    %113 = arith.mulf %107, %112 : vector<4x32xf32>
    %114 = arith.addf %109, %113 : vector<4x32xf32>
    %115 = math.tanh %114 : vector<4x32xf32>
    %116 = arith.subf %90, %115 : vector<4x32xf32>
    %117 = arith.mulf %108, %116 : vector<4x32xf32>
    %118 = arith.addf %115, %117 : vector<4x32xf32>
    %c4_i32 = arith.constant 4 : i32
    %119 = arith.index_cast %c4_i32 : i32 to index
    %c0_24 = arith.constant 0 : index
    %c0_25 = arith.constant 0 : index
    %120 = vector.load %arg2[%119, %c0_24, %c0_25] : memref<8x4x96xbf16, #tpu.memory_space<vmem>>, vector<1x4x96xbf16>
    %121 = vector.shape_cast %120 : vector<1x4x96xbf16> to vector<4x96xbf16>
    %122 = arith.extf %121 : vector<4x96xbf16> to vector<4x96xf32>
    %123 = vector.broadcast %4 : vector<1x96xf32> to vector<4x96xf32>
    %124 = arith.addf %122, %123 : vector<4x96xf32>
    %125 = arith.truncf %118 : vector<4x32xf32> to vector<4x32xbf16>
    %cst_26 = arith.constant dense<0.000000e+00> : vector<4x96xf32>
    %126 = tpu.matmul %125, %3, %cst_26 {dimension_numbers = #tpu.dot_dimension_numbers<[1], [0], [0], [1], [0, 0, 1, 1], [], []>} : vector<4x32xbf16>, vector<32x96xbf16>, vector<4x96xf32> -> vector<4x96xf32>
    %127 = vector.extract_strided_slice %124 {offsets = [0, 0], sizes = [4, 64], strides = [1, 1]} : vector<4x96xf32> to vector<4x64xf32>
    %128 = vector.extract_strided_slice %126 {offsets = [0, 0], sizes = [4, 64], strides = [1, 1]} : vector<4x96xf32> to vector<4x64xf32>
    %129 = arith.addf %127, %128 : vector<4x64xf32>
    %130 = arith.negf %129 : vector<4x64xf32>
    %131 = math.exp %130 : vector<4x64xf32>
    %cst_27 = arith.constant 1.000000e+00 : f32
    %132 = vector.broadcast %cst_27 : f32 to vector<4x64xf32>
    %133 = arith.addf %132, %131 : vector<4x64xf32>
    %134 = arith.divf %132, %133 : vector<4x64xf32>
    %135 = vector.extract_strided_slice %134 {offsets = [0, 0], sizes = [4, 32], strides = [1, 1]} : vector<4x64xf32> to vector<4x32xf32>
    %136 = vector.extract_strided_slice %134 {offsets = [0, 32], sizes = [4, 32], strides = [1, 1]} : vector<4x64xf32> to vector<4x32xf32>
    %137 = vector.extract_strided_slice %124 {offsets = [0, 64], sizes = [4, 32], strides = [1, 1]} : vector<4x96xf32> to vector<4x32xf32>
    %138 = vector.extract_strided_slice %126 {offsets = [0, 64], sizes = [4, 32], strides = [1, 1]} : vector<4x96xf32> to vector<4x32xf32>
    %139 = vector.broadcast %5 : vector<1x32xf32> to vector<4x32xf32>
    %140 = arith.addf %138, %139 : vector<4x32xf32>
    %141 = arith.mulf %135, %140 : vector<4x32xf32>
    %142 = arith.addf %137, %141 : vector<4x32xf32>
    %143 = math.tanh %142 : vector<4x32xf32>
    %144 = arith.subf %118, %143 : vector<4x32xf32>
    %145 = arith.mulf %136, %144 : vector<4x32xf32>
    %146 = arith.addf %143, %145 : vector<4x32xf32>
    %c5_i32 = arith.constant 5 : i32
    %147 = arith.index_cast %c5_i32 : i32 to index
    %c0_28 = arith.constant 0 : index
    %c0_29 = arith.constant 0 : index
    %148 = vector.load %arg2[%147, %c0_28, %c0_29] : memref<8x4x96xbf16, #tpu.memory_space<vmem>>, vector<1x4x96xbf16>
    %149 = vector.shape_cast %148 : vector<1x4x96xbf16> to vector<4x96xbf16>
    %150 = arith.extf %149 : vector<4x96xbf16> to vector<4x96xf32>
    %151 = vector.broadcast %4 : vector<1x96xf32> to vector<4x96xf32>
    %152 = arith.addf %150, %151 : vector<4x96xf32>
    %153 = arith.truncf %146 : vector<4x32xf32> to vector<4x32xbf16>
    %cst_30 = arith.constant dense<0.000000e+00> : vector<4x96xf32>
    %154 = tpu.matmul %153, %3, %cst_30 {dimension_numbers = #tpu.dot_dimension_numbers<[1], [0], [0], [1], [0, 0, 1, 1], [], []>} : vector<4x32xbf16>, vector<32x96xbf16>, vector<4x96xf32> -> vector<4x96xf32>
    %155 = vector.extract_strided_slice %152 {offsets = [0, 0], sizes = [4, 64], strides = [1, 1]} : vector<4x96xf32> to vector<4x64xf32>
    %156 = vector.extract_strided_slice %154 {offsets = [0, 0], sizes = [4, 64], strides = [1, 1]} : vector<4x96xf32> to vector<4x64xf32>
    %157 = arith.addf %155, %156 : vector<4x64xf32>
    %158 = arith.negf %157 : vector<4x64xf32>
    %159 = math.exp %158 : vector<4x64xf32>
    %cst_31 = arith.constant 1.000000e+00 : f32
    %160 = vector.broadcast %cst_31 : f32 to vector<4x64xf32>
    %161 = arith.addf %160, %159 : vector<4x64xf32>
    %162 = arith.divf %160, %161 : vector<4x64xf32>
    %163 = vector.extract_strided_slice %162 {offsets = [0, 0], sizes = [4, 32], strides = [1, 1]} : vector<4x64xf32> to vector<4x32xf32>
    %164 = vector.extract_strided_slice %162 {offsets = [0, 32], sizes = [4, 32], strides = [1, 1]} : vector<4x64xf32> to vector<4x32xf32>
    %165 = vector.extract_strided_slice %152 {offsets = [0, 64], sizes = [4, 32], strides = [1, 1]} : vector<4x96xf32> to vector<4x32xf32>
    %166 = vector.extract_strided_slice %154 {offsets = [0, 64], sizes = [4, 32], strides = [1, 1]} : vector<4x96xf32> to vector<4x32xf32>
    %167 = vector.broadcast %5 : vector<1x32xf32> to vector<4x32xf32>
    %168 = arith.addf %166, %167 : vector<4x32xf32>
    %169 = arith.mulf %163, %168 : vector<4x32xf32>
    %170 = arith.addf %165, %169 : vector<4x32xf32>
    %171 = math.tanh %170 : vector<4x32xf32>
    %172 = arith.subf %146, %171 : vector<4x32xf32>
    %173 = arith.mulf %164, %172 : vector<4x32xf32>
    %174 = arith.addf %171, %173 : vector<4x32xf32>
    %c6_i32 = arith.constant 6 : i32
    %175 = arith.index_cast %c6_i32 : i32 to index
    %c0_32 = arith.constant 0 : index
    %c0_33 = arith.constant 0 : index
    %176 = vector.load %arg2[%175, %c0_32, %c0_33] : memref<8x4x96xbf16, #tpu.memory_space<vmem>>, vector<1x4x96xbf16>
    %177 = vector.shape_cast %176 : vector<1x4x96xbf16> to vector<4x96xbf16>
    %178 = arith.extf %177 : vector<4x96xbf16> to vector<4x96xf32>
    %179 = vector.broadcast %4 : vector<1x96xf32> to vector<4x96xf32>
    %180 = arith.addf %178, %179 : vector<4x96xf32>
    %181 = arith.truncf %174 : vector<4x32xf32> to vector<4x32xbf16>
    %cst_34 = arith.constant dense<0.000000e+00> : vector<4x96xf32>
    %182 = tpu.matmul %181, %3, %cst_34 {dimension_numbers = #tpu.dot_dimension_numbers<[1], [0], [0], [1], [0, 0, 1, 1], [], []>} : vector<4x32xbf16>, vector<32x96xbf16>, vector<4x96xf32> -> vector<4x96xf32>
    %183 = vector.extract_strided_slice %180 {offsets = [0, 0], sizes = [4, 64], strides = [1, 1]} : vector<4x96xf32> to vector<4x64xf32>
    %184 = vector.extract_strided_slice %182 {offsets = [0, 0], sizes = [4, 64], strides = [1, 1]} : vector<4x96xf32> to vector<4x64xf32>
    %185 = arith.addf %183, %184 : vector<4x64xf32>
    %186 = arith.negf %185 : vector<4x64xf32>
    %187 = math.exp %186 : vector<4x64xf32>
    %cst_35 = arith.constant 1.000000e+00 : f32
    %188 = vector.broadcast %cst_35 : f32 to vector<4x64xf32>
    %189 = arith.addf %188, %187 : vector<4x64xf32>
    %190 = arith.divf %188, %189 : vector<4x64xf32>
    %191 = vector.extract_strided_slice %190 {offsets = [0, 0], sizes = [4, 32], strides = [1, 1]} : vector<4x64xf32> to vector<4x32xf32>
    %192 = vector.extract_strided_slice %190 {offsets = [0, 32], sizes = [4, 32], strides = [1, 1]} : vector<4x64xf32> to vector<4x32xf32>
    %193 = vector.extract_strided_slice %180 {offsets = [0, 64], sizes = [4, 32], strides = [1, 1]} : vector<4x96xf32> to vector<4x32xf32>
    %194 = vector.extract_strided_slice %182 {offsets = [0, 64], sizes = [4, 32], strides = [1, 1]} : vector<4x96xf32> to vector<4x32xf32>
    %195 = vector.broadcast %5 : vector<1x32xf32> to vector<4x32xf32>
    %196 = arith.addf %194, %195 : vector<4x32xf32>
    %197 = arith.mulf %191, %196 : vector<4x32xf32>
    %198 = arith.addf %193, %197 : vector<4x32xf32>
    %199 = math.tanh %198 : vector<4x32xf32>
    %200 = arith.subf %174, %199 : vector<4x32xf32>
    %201 = arith.mulf %192, %200 : vector<4x32xf32>
    %202 = arith.addf %199, %201 : vector<4x32xf32>
    %c7_i32 = arith.constant 7 : i32
    %203 = arith.index_cast %c7_i32 : i32 to index
    %c0_36 = arith.constant 0 : index
    %c0_37 = arith.constant 0 : index
    %204 = vector.load %arg2[%203, %c0_36, %c0_37] : memref<8x4x96xbf16, #tpu.memory_space<vmem>>, vector<1x4x96xbf16>
    %205 = vector.shape_cast %204 : vector<1x4x96xbf16> to vector<4x96xbf16>
    %206 = arith.extf %205 : vector<4x96xbf16> to vector<4x96xf32>
    %207 = vector.broadcast %4 : vector<1x96xf32> to vector<4x96xf32>
    %208 = arith.addf %206, %207 : vector<4x96xf32>
    %209 = arith.truncf %202 : vector<4x32xf32> to vector<4x32xbf16>
    %cst_38 = arith.constant dense<0.000000e+00> : vector<4x96xf32>
    %210 = tpu.matmul %209, %3, %cst_38 {dimension_numbers = #tpu.dot_dimension_numbers<[1], [0], [0], [1], [0, 0, 1, 1], [], []>} : vector<4x32xbf16>, vector<32x96xbf16>, vector<4x96xf32> -> vector<4x96xf32>
    %211 = vector.extract_strided_slice %208 {offsets = [0, 0], sizes = [4, 64], strides = [1, 1]} : vector<4x96xf32> to vector<4x64xf32>
    %212 = vector.extract_strided_slice %210 {offsets = [0, 0], sizes = [4, 64], strides = [1, 1]} : vector<4x96xf32> to vector<4x64xf32>
    %213 = arith.addf %211, %212 : vector<4x64xf32>
    %214 = arith.negf %213 : vector<4x64xf32>
    %215 = math.exp %214 : vector<4x64xf32>
    %cst_39 = arith.constant 1.000000e+00 : f32
    %216 = vector.broadcast %cst_39 : f32 to vector<4x64xf32>
    %217 = arith.addf %216, %215 : vector<4x64xf32>
    %218 = arith.divf %216, %217 : vector<4x64xf32>
    %219 = vector.extract_strided_slice %218 {offsets = [0, 0], sizes = [4, 32], strides = [1, 1]} : vector<4x64xf32> to vector<4x32xf32>
    %220 = vector.extract_strided_slice %218 {offsets = [0, 32], sizes = [4, 32], strides = [1, 1]} : vector<4x64xf32> to vector<4x32xf32>
    %221 = vector.extract_strided_slice %208 {offsets = [0, 64], sizes = [4, 32], strides = [1, 1]} : vector<4x96xf32> to vector<4x32xf32>
    %222 = vector.extract_strided_slice %210 {offsets = [0, 64], sizes = [4, 32], strides = [1, 1]} : vector<4x96xf32> to vector<4x32xf32>
    %223 = vector.broadcast %5 : vector<1x32xf32> to vector<4x32xf32>
    %224 = arith.addf %222, %223 : vector<4x32xf32>
    %225 = arith.mulf %219, %224 : vector<4x32xf32>
    %226 = arith.addf %221, %225 : vector<4x32xf32>
    %227 = math.tanh %226 : vector<4x32xf32>
    %228 = arith.subf %202, %227 : vector<4x32xf32>
    %229 = arith.mulf %220, %228 : vector<4x32xf32>
    %230 = arith.addf %227, %229 : vector<4x32xf32>
    %c8_i32 = arith.constant 8 : i32
    %c0_40 = arith.constant 0 : index
    %c0_41 = arith.constant 0 : index
    %231 = vector.load %arg7[%c0_40, %c0_41] : memref<4x32xf32, #tpu.memory_space<vmem>>, vector<4x32xf32>
    tpu.vector_store %arg7[%c0_40, %c0_41], %230 {strides = array<i32>} : memref<4x32xf32, #tpu.memory_space<vmem>>, vector<4x32xf32>,
    %c0_i32_42 = arith.constant 0 : i32
    %232 = arith.cmpi eq, %arg1, %c0_i32_42 : i32
    %233 = arith.extui %232 : i1 to i32
    %c0_i32_43 = arith.constant 0 : i32
    %234 = arith.cmpi ne, %233, %c0_i32_43 : i32
    scf.if %234 {
      %c0_44 = arith.constant 0 : index
      %c0_45 = arith.constant 0 : index
      %235 = vector.load %arg6[%c0_44, %c0_45] : memref<4x32xf32, #tpu.memory_space<vmem>>, vector<4x32xf32>
      tpu.vector_store %arg6[%c0_44, %c0_45], %230 {strides = array<i32>} : memref<4x32xf32, #tpu.memory_space<vmem>>, vector<4x32xf32>,
    } else {
    }
    return
  }
  func.func @transform_0(%arg0: i32, %arg1: i32) -> (i32, i32, i32) {
    %c1_i32 = arith.constant 1 : i32
    %0 = arith.muli %arg0, %c1_i32 : i32
    %1 = arith.addi %0, %arg1 : i32
    %c0_i32 = arith.constant 0 : i32
    %c0_i32_0 = arith.constant 0 : i32
    %c0_i32_1 = arith.constant 0 : i32
    return %1, %c0_i32, %c0_i32_0 : i32, i32, i32
  }
  func.func @transform_1(%arg0: i32, %arg1: i32) -> (i32, i32) {
    %c0_i32 = arith.constant 0 : i32
    %c0_i32_0 = arith.constant 0 : i32
    %c0_i32_1 = arith.constant 0 : i32
    return %c0_i32, %c0_i32_0 : i32, i32
  }
  func.func @transform_2(%arg0: i32, %arg1: i32) -> (i32, i32) {
    %c0_i32 = arith.constant 0 : i32
    %c0_i32_0 = arith.constant 0 : i32
    %c0_i32_1 = arith.constant 0 : i32
    return %c0_i32, %c0_i32_0 : i32, i32
  }
  func.func @transform_4(%arg0: i32, %arg1: i32) -> (i32, i32) {
    %c0_i32 = arith.constant 0 : i32
    %c0_i32_0 = arith.constant 0 : i32
    return %arg0, %c0_i32 : i32, i32
  }
}

module attributes {stable_mosaic.version = 11 : i64} {
  func.func @_gru_recurrent_kernel(%arg0: i32, %arg1: i32, %arg2: memref<8x4x96xbf16, #tpu.memory_space<vmem>>, %arg3: memref<1x96xf32, #tpu.memory_space<vmem>>, %arg4: memref<1x32xf32, #tpu.memory_space<vmem>>, %arg5: memref<32x96xbf16, #tpu.memory_space<any>>, %arg6: memref<8x4x32xbf16, #tpu.memory_space<vmem>>, %arg7: memref<4x32xf32, #tpu.memory_space<vmem>>, %arg8: memref<32x96xbf16, #tpu.memory_space<vmem>>) attributes {dimension_semantics = [#tpu.dimension_semantics<arbitrary>, #tpu.dimension_semantics<arbitrary>], iteration_bounds = array<i64: 1, 1>, scalar_prefetch = 0 : i64, scratch_operands = 2 : i64, tpu.core_type = #tpu.core_type<tc>, window_params = [{transform_indices = @transform_0, window_bounds = array<i64: 8, 4, 96>}, {pipeline_mode = #tpu.pipeline_mode<synchronous>, transform_indices = @transform_1, window_bounds = array<i64: 1, 96>}, {pipeline_mode = #tpu.pipeline_mode<synchronous>, transform_indices = @transform_2, window_bounds = array<i64: 1, 32>}, {}, {transform_indices = @transform_4, window_bounds = array<i64: 8, 4, 32>}]} {
    %c0_i32 = arith.constant 0 : i32
    %0 = arith.cmpi eq, %arg1, %c0_i32 : i32
    %1 = arith.extui %0 : i1 to i32
    %c0_i32_0 = arith.constant 0 : i32
    %2 = arith.cmpi ne, %1, %c0_i32_0 : i32
    scf.if %2 {
      %cst_58 = arith.constant 0.000000e+00 : f32
      %272 = vector.broadcast %cst_58 : f32 to vector<4x32xf32>
      %c0_59 = arith.constant 0 : index
      %c0_60 = arith.constant 0 : index
      %273 = vector.load %arg7[%c0_59, %c0_60] : memref<4x32xf32, #tpu.memory_space<vmem>>, vector<4x32xf32>
      tpu.vector_store %arg7[%c0_59, %c0_60], %272 {strides = array<i32>} : memref<4x32xf32, #tpu.memory_space<vmem>>, vector<4x32xf32>,
      "tpu.region"() ({
        %274 = tpu.sem_alloc : memref<!tpu.dma_semaphore, #tpu.memory_space<semaphore_mem>>
        tpu.enqueue_dma source(%arg5 : memref<32x96xbf16, #tpu.memory_space<any>>) target(%arg8 : memref<32x96xbf16, #tpu.memory_space<vmem>>) target_semaphore(%274 : memref<!tpu.dma_semaphore, #tpu.memory_space<semaphore_mem>>)
        tpu.wait_dma2 semaphore(%274 : memref<!tpu.dma_semaphore, #tpu.memory_space<semaphore_mem>>) src(%arg5 : memref<32x96xbf16, #tpu.memory_space<any>>) dst(%arg8 : memref<32x96xbf16, #tpu.memory_space<vmem>>)
        tpu.yield
      }) : () -> ()
    } else {
    }
    %c0 = arith.constant 0 : index
    %c0_1 = arith.constant 0 : index
    %3 = vector.load %arg8[%c0, %c0_1] : memref<32x96xbf16, #tpu.memory_space<vmem>>, vector<32x96xbf16>
    %c0_2 = arith.constant 0 : index
    %c0_3 = arith.constant 0 : index
    %4 = vector.load %arg3[%c0_2, %c0_3] : memref<1x96xf32, #tpu.memory_space<vmem>>, vector<1x96xf32>
    %c0_4 = arith.constant 0 : index
    %c0_5 = arith.constant 0 : index
    %5 = vector.load %arg4[%c0_4, %c0_5] : memref<1x32xf32, #tpu.memory_space<vmem>>, vector<1x32xf32>
    %c0_6 = arith.constant 0 : index
    %c0_7 = arith.constant 0 : index
    %6 = vector.load %arg7[%c0_6, %c0_7] : memref<4x32xf32, #tpu.memory_space<vmem>>, vector<4x32xf32>
    %c0_i32_8 = arith.constant 0 : i32
    %7 = arith.index_cast %c0_i32_8 : i32 to index
    %c0_9 = arith.constant 0 : index
    %c0_10 = arith.constant 0 : index
    %8 = vector.load %arg2[%7, %c0_9, %c0_10] : memref<8x4x96xbf16, #tpu.memory_space<vmem>>, vector<1x4x96xbf16>
    %9 = vector.shape_cast %8 : vector<1x4x96xbf16> to vector<4x96xbf16>
    %10 = arith.extf %9 : vector<4x96xbf16> to vector<4x96xf32>
    %11 = vector.broadcast %4 : vector<1x96xf32> to vector<4x96xf32>
    %12 = arith.addf %10, %11 : vector<4x96xf32>
    %13 = arith.truncf %6 : vector<4x32xf32> to vector<4x32xbf16>
    %cst = arith.constant dense<0.000000e+00> : vector<4x96xf32>
    %14 = tpu.matmul %13, %3, %cst {dimension_numbers = #tpu.dot_dimension_numbers<[1], [0], [0], [1], [0, 0, 1, 1], [], []>} : vector<4x32xbf16>, vector<32x96xbf16>, vector<4x96xf32> -> vector<4x96xf32>
    %15 = vector.extract_strided_slice %12 {offsets = [0, 0], sizes = [4, 64], strides = [1, 1]} : vector<4x96xf32> to vector<4x64xf32>
    %16 = vector.extract_strided_slice %14 {offsets = [0, 0], sizes = [4, 64], strides = [1, 1]} : vector<4x96xf32> to vector<4x64xf32>
    %17 = arith.addf %15, %16 : vector<4x64xf32>
    %18 = arith.negf %17 : vector<4x64xf32>
    %19 = math.exp %18 : vector<4x64xf32>
    %cst_11 = arith.constant 1.000000e+00 : f32
    %20 = vector.broadcast %cst_11 : f32 to vector<4x64xf32>
    %21 = arith.addf %20, %19 : vector<4x64xf32>
    %22 = arith.divf %20, %21 : vector<4x64xf32>
    %23 = vector.extract_strided_slice %22 {offsets = [0, 0], sizes = [4, 32], strides = [1, 1]} : vector<4x64xf32> to vector<4x32xf32>
    %24 = vector.extract_strided_slice %22 {offsets = [0, 32], sizes = [4, 32], strides = [1, 1]} : vector<4x64xf32> to vector<4x32xf32>
    %25 = vector.extract_strided_slice %12 {offsets = [0, 64], sizes = [4, 32], strides = [1, 1]} : vector<4x96xf32> to vector<4x32xf32>
    %26 = vector.extract_strided_slice %14 {offsets = [0, 64], sizes = [4, 32], strides = [1, 1]} : vector<4x96xf32> to vector<4x32xf32>
    %27 = vector.broadcast %5 : vector<1x32xf32> to vector<4x32xf32>
    %28 = arith.addf %26, %27 : vector<4x32xf32>
    %29 = arith.mulf %23, %28 : vector<4x32xf32>
    %30 = arith.addf %25, %29 : vector<4x32xf32>
    %31 = math.tanh %30 : vector<4x32xf32>
    %32 = arith.subf %6, %31 : vector<4x32xf32>
    %33 = arith.mulf %24, %32 : vector<4x32xf32>
    %34 = arith.addf %31, %33 : vector<4x32xf32>
    %35 = arith.truncf %34 : vector<4x32xf32> to vector<4x32xbf16>
    %36 = arith.index_cast %c0_i32_8 : i32 to index
    %c0_12 = arith.constant 0 : index
    %c0_13 = arith.constant 0 : index
    %37 = vector.load %arg6[%36, %c0_12, %c0_13] : memref<8x4x32xbf16, #tpu.memory_space<vmem>>, vector<1x4x32xbf16>
    %38 = vector.shape_cast %37 : vector<1x4x32xbf16> to vector<4x32xbf16>
    %39 = vector.shape_cast %35 : vector<4x32xbf16> to vector<1x4x32xbf16>
    tpu.vector_store %arg6[%36, %c0_12, %c0_13], %39 {strides = array<i32>} : memref<8x4x32xbf16, #tpu.memory_space<vmem>>, vector<1x4x32xbf16>,
    %c1_i32 = arith.constant 1 : i32
    %40 = arith.index_cast %c1_i32 : i32 to index
    %c0_14 = arith.constant 0 : index
    %c0_15 = arith.constant 0 : index
    %41 = vector.load %arg2[%40, %c0_14, %c0_15] : memref<8x4x96xbf16, #tpu.memory_space<vmem>>, vector<1x4x96xbf16>
    %42 = vector.shape_cast %41 : vector<1x4x96xbf16> to vector<4x96xbf16>
    %43 = arith.extf %42 : vector<4x96xbf16> to vector<4x96xf32>
    %44 = vector.broadcast %4 : vector<1x96xf32> to vector<4x96xf32>
    %45 = arith.addf %43, %44 : vector<4x96xf32>
    %46 = arith.truncf %34 : vector<4x32xf32> to vector<4x32xbf16>
    %cst_16 = arith.constant dense<0.000000e+00> : vector<4x96xf32>
    %47 = tpu.matmul %46, %3, %cst_16 {dimension_numbers = #tpu.dot_dimension_numbers<[1], [0], [0], [1], [0, 0, 1, 1], [], []>} : vector<4x32xbf16>, vector<32x96xbf16>, vector<4x96xf32> -> vector<4x96xf32>
    %48 = vector.extract_strided_slice %45 {offsets = [0, 0], sizes = [4, 64], strides = [1, 1]} : vector<4x96xf32> to vector<4x64xf32>
    %49 = vector.extract_strided_slice %47 {offsets = [0, 0], sizes = [4, 64], strides = [1, 1]} : vector<4x96xf32> to vector<4x64xf32>
    %50 = arith.addf %48, %49 : vector<4x64xf32>
    %51 = arith.negf %50 : vector<4x64xf32>
    %52 = math.exp %51 : vector<4x64xf32>
    %cst_17 = arith.constant 1.000000e+00 : f32
    %53 = vector.broadcast %cst_17 : f32 to vector<4x64xf32>
    %54 = arith.addf %53, %52 : vector<4x64xf32>
    %55 = arith.divf %53, %54 : vector<4x64xf32>
    %56 = vector.extract_strided_slice %55 {offsets = [0, 0], sizes = [4, 32], strides = [1, 1]} : vector<4x64xf32> to vector<4x32xf32>
    %57 = vector.extract_strided_slice %55 {offsets = [0, 32], sizes = [4, 32], strides = [1, 1]} : vector<4x64xf32> to vector<4x32xf32>
    %58 = vector.extract_strided_slice %45 {offsets = [0, 64], sizes = [4, 32], strides = [1, 1]} : vector<4x96xf32> to vector<4x32xf32>
    %59 = vector.extract_strided_slice %47 {offsets = [0, 64], sizes = [4, 32], strides = [1, 1]} : vector<4x96xf32> to vector<4x32xf32>
    %60 = vector.broadcast %5 : vector<1x32xf32> to vector<4x32xf32>
    %61 = arith.addf %59, %60 : vector<4x32xf32>
    %62 = arith.mulf %56, %61 : vector<4x32xf32>
    %63 = arith.addf %58, %62 : vector<4x32xf32>
    %64 = math.tanh %63 : vector<4x32xf32>
    %65 = arith.subf %34, %64 : vector<4x32xf32>
    %66 = arith.mulf %57, %65 : vector<4x32xf32>
    %67 = arith.addf %64, %66 : vector<4x32xf32>
    %68 = arith.truncf %67 : vector<4x32xf32> to vector<4x32xbf16>
    %69 = arith.index_cast %c1_i32 : i32 to index
    %c0_18 = arith.constant 0 : index
    %c0_19 = arith.constant 0 : index
    %70 = vector.load %arg6[%69, %c0_18, %c0_19] : memref<8x4x32xbf16, #tpu.memory_space<vmem>>, vector<1x4x32xbf16>
    %71 = vector.shape_cast %70 : vector<1x4x32xbf16> to vector<4x32xbf16>
    %72 = vector.shape_cast %68 : vector<4x32xbf16> to vector<1x4x32xbf16>
    tpu.vector_store %arg6[%69, %c0_18, %c0_19], %72 {strides = array<i32>} : memref<8x4x32xbf16, #tpu.memory_space<vmem>>, vector<1x4x32xbf16>,
    %c2_i32 = arith.constant 2 : i32
    %73 = arith.index_cast %c2_i32 : i32 to index
    %c0_20 = arith.constant 0 : index
    %c0_21 = arith.constant 0 : index
    %74 = vector.load %arg2[%73, %c0_20, %c0_21] : memref<8x4x96xbf16, #tpu.memory_space<vmem>>, vector<1x4x96xbf16>
    %75 = vector.shape_cast %74 : vector<1x4x96xbf16> to vector<4x96xbf16>
    %76 = arith.extf %75 : vector<4x96xbf16> to vector<4x96xf32>
    %77 = vector.broadcast %4 : vector<1x96xf32> to vector<4x96xf32>
    %78 = arith.addf %76, %77 : vector<4x96xf32>
    %79 = arith.truncf %67 : vector<4x32xf32> to vector<4x32xbf16>
    %cst_22 = arith.constant dense<0.000000e+00> : vector<4x96xf32>
    %80 = tpu.matmul %79, %3, %cst_22 {dimension_numbers = #tpu.dot_dimension_numbers<[1], [0], [0], [1], [0, 0, 1, 1], [], []>} : vector<4x32xbf16>, vector<32x96xbf16>, vector<4x96xf32> -> vector<4x96xf32>
    %81 = vector.extract_strided_slice %78 {offsets = [0, 0], sizes = [4, 64], strides = [1, 1]} : vector<4x96xf32> to vector<4x64xf32>
    %82 = vector.extract_strided_slice %80 {offsets = [0, 0], sizes = [4, 64], strides = [1, 1]} : vector<4x96xf32> to vector<4x64xf32>
    %83 = arith.addf %81, %82 : vector<4x64xf32>
    %84 = arith.negf %83 : vector<4x64xf32>
    %85 = math.exp %84 : vector<4x64xf32>
    %cst_23 = arith.constant 1.000000e+00 : f32
    %86 = vector.broadcast %cst_23 : f32 to vector<4x64xf32>
    %87 = arith.addf %86, %85 : vector<4x64xf32>
    %88 = arith.divf %86, %87 : vector<4x64xf32>
    %89 = vector.extract_strided_slice %88 {offsets = [0, 0], sizes = [4, 32], strides = [1, 1]} : vector<4x64xf32> to vector<4x32xf32>
    %90 = vector.extract_strided_slice %88 {offsets = [0, 32], sizes = [4, 32], strides = [1, 1]} : vector<4x64xf32> to vector<4x32xf32>
    %91 = vector.extract_strided_slice %78 {offsets = [0, 64], sizes = [4, 32], strides = [1, 1]} : vector<4x96xf32> to vector<4x32xf32>
    %92 = vector.extract_strided_slice %80 {offsets = [0, 64], sizes = [4, 32], strides = [1, 1]} : vector<4x96xf32> to vector<4x32xf32>
    %93 = vector.broadcast %5 : vector<1x32xf32> to vector<4x32xf32>
    %94 = arith.addf %92, %93 : vector<4x32xf32>
    %95 = arith.mulf %89, %94 : vector<4x32xf32>
    %96 = arith.addf %91, %95 : vector<4x32xf32>
    %97 = math.tanh %96 : vector<4x32xf32>
    %98 = arith.subf %67, %97 : vector<4x32xf32>
    %99 = arith.mulf %90, %98 : vector<4x32xf32>
    %100 = arith.addf %97, %99 : vector<4x32xf32>
    %101 = arith.truncf %100 : vector<4x32xf32> to vector<4x32xbf16>
    %102 = arith.index_cast %c2_i32 : i32 to index
    %c0_24 = arith.constant 0 : index
    %c0_25 = arith.constant 0 : index
    %103 = vector.load %arg6[%102, %c0_24, %c0_25] : memref<8x4x32xbf16, #tpu.memory_space<vmem>>, vector<1x4x32xbf16>
    %104 = vector.shape_cast %103 : vector<1x4x32xbf16> to vector<4x32xbf16>
    %105 = vector.shape_cast %101 : vector<4x32xbf16> to vector<1x4x32xbf16>
    tpu.vector_store %arg6[%102, %c0_24, %c0_25], %105 {strides = array<i32>} : memref<8x4x32xbf16, #tpu.memory_space<vmem>>, vector<1x4x32xbf16>,
    %c3_i32 = arith.constant 3 : i32
    %106 = arith.index_cast %c3_i32 : i32 to index
    %c0_26 = arith.constant 0 : index
    %c0_27 = arith.constant 0 : index
    %107 = vector.load %arg2[%106, %c0_26, %c0_27] : memref<8x4x96xbf16, #tpu.memory_space<vmem>>, vector<1x4x96xbf16>
    %108 = vector.shape_cast %107 : vector<1x4x96xbf16> to vector<4x96xbf16>
    %109 = arith.extf %108 : vector<4x96xbf16> to vector<4x96xf32>
    %110 = vector.broadcast %4 : vector<1x96xf32> to vector<4x96xf32>
    %111 = arith.addf %109, %110 : vector<4x96xf32>
    %112 = arith.truncf %100 : vector<4x32xf32> to vector<4x32xbf16>
    %cst_28 = arith.constant dense<0.000000e+00> : vector<4x96xf32>
    %113 = tpu.matmul %112, %3, %cst_28 {dimension_numbers = #tpu.dot_dimension_numbers<[1], [0], [0], [1], [0, 0, 1, 1], [], []>} : vector<4x32xbf16>, vector<32x96xbf16>, vector<4x96xf32> -> vector<4x96xf32>
    %114 = vector.extract_strided_slice %111 {offsets = [0, 0], sizes = [4, 64], strides = [1, 1]} : vector<4x96xf32> to vector<4x64xf32>
    %115 = vector.extract_strided_slice %113 {offsets = [0, 0], sizes = [4, 64], strides = [1, 1]} : vector<4x96xf32> to vector<4x64xf32>
    %116 = arith.addf %114, %115 : vector<4x64xf32>
    %117 = arith.negf %116 : vector<4x64xf32>
    %118 = math.exp %117 : vector<4x64xf32>
    %cst_29 = arith.constant 1.000000e+00 : f32
    %119 = vector.broadcast %cst_29 : f32 to vector<4x64xf32>
    %120 = arith.addf %119, %118 : vector<4x64xf32>
    %121 = arith.divf %119, %120 : vector<4x64xf32>
    %122 = vector.extract_strided_slice %121 {offsets = [0, 0], sizes = [4, 32], strides = [1, 1]} : vector<4x64xf32> to vector<4x32xf32>
    %123 = vector.extract_strided_slice %121 {offsets = [0, 32], sizes = [4, 32], strides = [1, 1]} : vector<4x64xf32> to vector<4x32xf32>
    %124 = vector.extract_strided_slice %111 {offsets = [0, 64], sizes = [4, 32], strides = [1, 1]} : vector<4x96xf32> to vector<4x32xf32>
    %125 = vector.extract_strided_slice %113 {offsets = [0, 64], sizes = [4, 32], strides = [1, 1]} : vector<4x96xf32> to vector<4x32xf32>
    %126 = vector.broadcast %5 : vector<1x32xf32> to vector<4x32xf32>
    %127 = arith.addf %125, %126 : vector<4x32xf32>
    %128 = arith.mulf %122, %127 : vector<4x32xf32>
    %129 = arith.addf %124, %128 : vector<4x32xf32>
    %130 = math.tanh %129 : vector<4x32xf32>
    %131 = arith.subf %100, %130 : vector<4x32xf32>
    %132 = arith.mulf %123, %131 : vector<4x32xf32>
    %133 = arith.addf %130, %132 : vector<4x32xf32>
    %134 = arith.truncf %133 : vector<4x32xf32> to vector<4x32xbf16>
    %135 = arith.index_cast %c3_i32 : i32 to index
    %c0_30 = arith.constant 0 : index
    %c0_31 = arith.constant 0 : index
    %136 = vector.load %arg6[%135, %c0_30, %c0_31] : memref<8x4x32xbf16, #tpu.memory_space<vmem>>, vector<1x4x32xbf16>
    %137 = vector.shape_cast %136 : vector<1x4x32xbf16> to vector<4x32xbf16>
    %138 = vector.shape_cast %134 : vector<4x32xbf16> to vector<1x4x32xbf16>
    tpu.vector_store %arg6[%135, %c0_30, %c0_31], %138 {strides = array<i32>} : memref<8x4x32xbf16, #tpu.memory_space<vmem>>, vector<1x4x32xbf16>,
    %c4_i32 = arith.constant 4 : i32
    %139 = arith.index_cast %c4_i32 : i32 to index
    %c0_32 = arith.constant 0 : index
    %c0_33 = arith.constant 0 : index
    %140 = vector.load %arg2[%139, %c0_32, %c0_33] : memref<8x4x96xbf16, #tpu.memory_space<vmem>>, vector<1x4x96xbf16>
    %141 = vector.shape_cast %140 : vector<1x4x96xbf16> to vector<4x96xbf16>
    %142 = arith.extf %141 : vector<4x96xbf16> to vector<4x96xf32>
    %143 = vector.broadcast %4 : vector<1x96xf32> to vector<4x96xf32>
    %144 = arith.addf %142, %143 : vector<4x96xf32>
    %145 = arith.truncf %133 : vector<4x32xf32> to vector<4x32xbf16>
    %cst_34 = arith.constant dense<0.000000e+00> : vector<4x96xf32>
    %146 = tpu.matmul %145, %3, %cst_34 {dimension_numbers = #tpu.dot_dimension_numbers<[1], [0], [0], [1], [0, 0, 1, 1], [], []>} : vector<4x32xbf16>, vector<32x96xbf16>, vector<4x96xf32> -> vector<4x96xf32>
    %147 = vector.extract_strided_slice %144 {offsets = [0, 0], sizes = [4, 64], strides = [1, 1]} : vector<4x96xf32> to vector<4x64xf32>
    %148 = vector.extract_strided_slice %146 {offsets = [0, 0], sizes = [4, 64], strides = [1, 1]} : vector<4x96xf32> to vector<4x64xf32>
    %149 = arith.addf %147, %148 : vector<4x64xf32>
    %150 = arith.negf %149 : vector<4x64xf32>
    %151 = math.exp %150 : vector<4x64xf32>
    %cst_35 = arith.constant 1.000000e+00 : f32
    %152 = vector.broadcast %cst_35 : f32 to vector<4x64xf32>
    %153 = arith.addf %152, %151 : vector<4x64xf32>
    %154 = arith.divf %152, %153 : vector<4x64xf32>
    %155 = vector.extract_strided_slice %154 {offsets = [0, 0], sizes = [4, 32], strides = [1, 1]} : vector<4x64xf32> to vector<4x32xf32>
    %156 = vector.extract_strided_slice %154 {offsets = [0, 32], sizes = [4, 32], strides = [1, 1]} : vector<4x64xf32> to vector<4x32xf32>
    %157 = vector.extract_strided_slice %144 {offsets = [0, 64], sizes = [4, 32], strides = [1, 1]} : vector<4x96xf32> to vector<4x32xf32>
    %158 = vector.extract_strided_slice %146 {offsets = [0, 64], sizes = [4, 32], strides = [1, 1]} : vector<4x96xf32> to vector<4x32xf32>
    %159 = vector.broadcast %5 : vector<1x32xf32> to vector<4x32xf32>
    %160 = arith.addf %158, %159 : vector<4x32xf32>
    %161 = arith.mulf %155, %160 : vector<4x32xf32>
    %162 = arith.addf %157, %161 : vector<4x32xf32>
    %163 = math.tanh %162 : vector<4x32xf32>
    %164 = arith.subf %133, %163 : vector<4x32xf32>
    %165 = arith.mulf %156, %164 : vector<4x32xf32>
    %166 = arith.addf %163, %165 : vector<4x32xf32>
    %167 = arith.truncf %166 : vector<4x32xf32> to vector<4x32xbf16>
    %168 = arith.index_cast %c4_i32 : i32 to index
    %c0_36 = arith.constant 0 : index
    %c0_37 = arith.constant 0 : index
    %169 = vector.load %arg6[%168, %c0_36, %c0_37] : memref<8x4x32xbf16, #tpu.memory_space<vmem>>, vector<1x4x32xbf16>
    %170 = vector.shape_cast %169 : vector<1x4x32xbf16> to vector<4x32xbf16>
    %171 = vector.shape_cast %167 : vector<4x32xbf16> to vector<1x4x32xbf16>
    tpu.vector_store %arg6[%168, %c0_36, %c0_37], %171 {strides = array<i32>} : memref<8x4x32xbf16, #tpu.memory_space<vmem>>, vector<1x4x32xbf16>,
    %c5_i32 = arith.constant 5 : i32
    %172 = arith.index_cast %c5_i32 : i32 to index
    %c0_38 = arith.constant 0 : index
    %c0_39 = arith.constant 0 : index
    %173 = vector.load %arg2[%172, %c0_38, %c0_39] : memref<8x4x96xbf16, #tpu.memory_space<vmem>>, vector<1x4x96xbf16>
    %174 = vector.shape_cast %173 : vector<1x4x96xbf16> to vector<4x96xbf16>
    %175 = arith.extf %174 : vector<4x96xbf16> to vector<4x96xf32>
    %176 = vector.broadcast %4 : vector<1x96xf32> to vector<4x96xf32>
    %177 = arith.addf %175, %176 : vector<4x96xf32>
    %178 = arith.truncf %166 : vector<4x32xf32> to vector<4x32xbf16>
    %cst_40 = arith.constant dense<0.000000e+00> : vector<4x96xf32>
    %179 = tpu.matmul %178, %3, %cst_40 {dimension_numbers = #tpu.dot_dimension_numbers<[1], [0], [0], [1], [0, 0, 1, 1], [], []>} : vector<4x32xbf16>, vector<32x96xbf16>, vector<4x96xf32> -> vector<4x96xf32>
    %180 = vector.extract_strided_slice %177 {offsets = [0, 0], sizes = [4, 64], strides = [1, 1]} : vector<4x96xf32> to vector<4x64xf32>
    %181 = vector.extract_strided_slice %179 {offsets = [0, 0], sizes = [4, 64], strides = [1, 1]} : vector<4x96xf32> to vector<4x64xf32>
    %182 = arith.addf %180, %181 : vector<4x64xf32>
    %183 = arith.negf %182 : vector<4x64xf32>
    %184 = math.exp %183 : vector<4x64xf32>
    %cst_41 = arith.constant 1.000000e+00 : f32
    %185 = vector.broadcast %cst_41 : f32 to vector<4x64xf32>
    %186 = arith.addf %185, %184 : vector<4x64xf32>
    %187 = arith.divf %185, %186 : vector<4x64xf32>
    %188 = vector.extract_strided_slice %187 {offsets = [0, 0], sizes = [4, 32], strides = [1, 1]} : vector<4x64xf32> to vector<4x32xf32>
    %189 = vector.extract_strided_slice %187 {offsets = [0, 32], sizes = [4, 32], strides = [1, 1]} : vector<4x64xf32> to vector<4x32xf32>
    %190 = vector.extract_strided_slice %177 {offsets = [0, 64], sizes = [4, 32], strides = [1, 1]} : vector<4x96xf32> to vector<4x32xf32>
    %191 = vector.extract_strided_slice %179 {offsets = [0, 64], sizes = [4, 32], strides = [1, 1]} : vector<4x96xf32> to vector<4x32xf32>
    %192 = vector.broadcast %5 : vector<1x32xf32> to vector<4x32xf32>
    %193 = arith.addf %191, %192 : vector<4x32xf32>
    %194 = arith.mulf %188, %193 : vector<4x32xf32>
    %195 = arith.addf %190, %194 : vector<4x32xf32>
    %196 = math.tanh %195 : vector<4x32xf32>
    %197 = arith.subf %166, %196 : vector<4x32xf32>
    %198 = arith.mulf %189, %197 : vector<4x32xf32>
    %199 = arith.addf %196, %198 : vector<4x32xf32>
    %200 = arith.truncf %199 : vector<4x32xf32> to vector<4x32xbf16>
    %201 = arith.index_cast %c5_i32 : i32 to index
    %c0_42 = arith.constant 0 : index
    %c0_43 = arith.constant 0 : index
    %202 = vector.load %arg6[%201, %c0_42, %c0_43] : memref<8x4x32xbf16, #tpu.memory_space<vmem>>, vector<1x4x32xbf16>
    %203 = vector.shape_cast %202 : vector<1x4x32xbf16> to vector<4x32xbf16>
    %204 = vector.shape_cast %200 : vector<4x32xbf16> to vector<1x4x32xbf16>
    tpu.vector_store %arg6[%201, %c0_42, %c0_43], %204 {strides = array<i32>} : memref<8x4x32xbf16, #tpu.memory_space<vmem>>, vector<1x4x32xbf16>,
    %c6_i32 = arith.constant 6 : i32
    %205 = arith.index_cast %c6_i32 : i32 to index
    %c0_44 = arith.constant 0 : index
    %c0_45 = arith.constant 0 : index
    %206 = vector.load %arg2[%205, %c0_44, %c0_45] : memref<8x4x96xbf16, #tpu.memory_space<vmem>>, vector<1x4x96xbf16>
    %207 = vector.shape_cast %206 : vector<1x4x96xbf16> to vector<4x96xbf16>
    %208 = arith.extf %207 : vector<4x96xbf16> to vector<4x96xf32>
    %209 = vector.broadcast %4 : vector<1x96xf32> to vector<4x96xf32>
    %210 = arith.addf %208, %209 : vector<4x96xf32>
    %211 = arith.truncf %199 : vector<4x32xf32> to vector<4x32xbf16>
    %cst_46 = arith.constant dense<0.000000e+00> : vector<4x96xf32>
    %212 = tpu.matmul %211, %3, %cst_46 {dimension_numbers = #tpu.dot_dimension_numbers<[1], [0], [0], [1], [0, 0, 1, 1], [], []>} : vector<4x32xbf16>, vector<32x96xbf16>, vector<4x96xf32> -> vector<4x96xf32>
    %213 = vector.extract_strided_slice %210 {offsets = [0, 0], sizes = [4, 64], strides = [1, 1]} : vector<4x96xf32> to vector<4x64xf32>
    %214 = vector.extract_strided_slice %212 {offsets = [0, 0], sizes = [4, 64], strides = [1, 1]} : vector<4x96xf32> to vector<4x64xf32>
    %215 = arith.addf %213, %214 : vector<4x64xf32>
    %216 = arith.negf %215 : vector<4x64xf32>
    %217 = math.exp %216 : vector<4x64xf32>
    %cst_47 = arith.constant 1.000000e+00 : f32
    %218 = vector.broadcast %cst_47 : f32 to vector<4x64xf32>
    %219 = arith.addf %218, %217 : vector<4x64xf32>
    %220 = arith.divf %218, %219 : vector<4x64xf32>
    %221 = vector.extract_strided_slice %220 {offsets = [0, 0], sizes = [4, 32], strides = [1, 1]} : vector<4x64xf32> to vector<4x32xf32>
    %222 = vector.extract_strided_slice %220 {offsets = [0, 32], sizes = [4, 32], strides = [1, 1]} : vector<4x64xf32> to vector<4x32xf32>
    %223 = vector.extract_strided_slice %210 {offsets = [0, 64], sizes = [4, 32], strides = [1, 1]} : vector<4x96xf32> to vector<4x32xf32>
    %224 = vector.extract_strided_slice %212 {offsets = [0, 64], sizes = [4, 32], strides = [1, 1]} : vector<4x96xf32> to vector<4x32xf32>
    %225 = vector.broadcast %5 : vector<1x32xf32> to vector<4x32xf32>
    %226 = arith.addf %224, %225 : vector<4x32xf32>
    %227 = arith.mulf %221, %226 : vector<4x32xf32>
    %228 = arith.addf %223, %227 : vector<4x32xf32>
    %229 = math.tanh %228 : vector<4x32xf32>
    %230 = arith.subf %199, %229 : vector<4x32xf32>
    %231 = arith.mulf %222, %230 : vector<4x32xf32>
    %232 = arith.addf %229, %231 : vector<4x32xf32>
    %233 = arith.truncf %232 : vector<4x32xf32> to vector<4x32xbf16>
    %234 = arith.index_cast %c6_i32 : i32 to index
    %c0_48 = arith.constant 0 : index
    %c0_49 = arith.constant 0 : index
    %235 = vector.load %arg6[%234, %c0_48, %c0_49] : memref<8x4x32xbf16, #tpu.memory_space<vmem>>, vector<1x4x32xbf16>
    %236 = vector.shape_cast %235 : vector<1x4x32xbf16> to vector<4x32xbf16>
    %237 = vector.shape_cast %233 : vector<4x32xbf16> to vector<1x4x32xbf16>
    tpu.vector_store %arg6[%234, %c0_48, %c0_49], %237 {strides = array<i32>} : memref<8x4x32xbf16, #tpu.memory_space<vmem>>, vector<1x4x32xbf16>,
    %c7_i32 = arith.constant 7 : i32
    %238 = arith.index_cast %c7_i32 : i32 to index
    %c0_50 = arith.constant 0 : index
    %c0_51 = arith.constant 0 : index
    %239 = vector.load %arg2[%238, %c0_50, %c0_51] : memref<8x4x96xbf16, #tpu.memory_space<vmem>>, vector<1x4x96xbf16>
    %240 = vector.shape_cast %239 : vector<1x4x96xbf16> to vector<4x96xbf16>
    %241 = arith.extf %240 : vector<4x96xbf16> to vector<4x96xf32>
    %242 = vector.broadcast %4 : vector<1x96xf32> to vector<4x96xf32>
    %243 = arith.addf %241, %242 : vector<4x96xf32>
    %244 = arith.truncf %232 : vector<4x32xf32> to vector<4x32xbf16>
    %cst_52 = arith.constant dense<0.000000e+00> : vector<4x96xf32>
    %245 = tpu.matmul %244, %3, %cst_52 {dimension_numbers = #tpu.dot_dimension_numbers<[1], [0], [0], [1], [0, 0, 1, 1], [], []>} : vector<4x32xbf16>, vector<32x96xbf16>, vector<4x96xf32> -> vector<4x96xf32>
    %246 = vector.extract_strided_slice %243 {offsets = [0, 0], sizes = [4, 64], strides = [1, 1]} : vector<4x96xf32> to vector<4x64xf32>
    %247 = vector.extract_strided_slice %245 {offsets = [0, 0], sizes = [4, 64], strides = [1, 1]} : vector<4x96xf32> to vector<4x64xf32>
    %248 = arith.addf %246, %247 : vector<4x64xf32>
    %249 = arith.negf %248 : vector<4x64xf32>
    %250 = math.exp %249 : vector<4x64xf32>
    %cst_53 = arith.constant 1.000000e+00 : f32
    %251 = vector.broadcast %cst_53 : f32 to vector<4x64xf32>
    %252 = arith.addf %251, %250 : vector<4x64xf32>
    %253 = arith.divf %251, %252 : vector<4x64xf32>
    %254 = vector.extract_strided_slice %253 {offsets = [0, 0], sizes = [4, 32], strides = [1, 1]} : vector<4x64xf32> to vector<4x32xf32>
    %255 = vector.extract_strided_slice %253 {offsets = [0, 32], sizes = [4, 32], strides = [1, 1]} : vector<4x64xf32> to vector<4x32xf32>
    %256 = vector.extract_strided_slice %243 {offsets = [0, 64], sizes = [4, 32], strides = [1, 1]} : vector<4x96xf32> to vector<4x32xf32>
    %257 = vector.extract_strided_slice %245 {offsets = [0, 64], sizes = [4, 32], strides = [1, 1]} : vector<4x96xf32> to vector<4x32xf32>
    %258 = vector.broadcast %5 : vector<1x32xf32> to vector<4x32xf32>
    %259 = arith.addf %257, %258 : vector<4x32xf32>
    %260 = arith.mulf %254, %259 : vector<4x32xf32>
    %261 = arith.addf %256, %260 : vector<4x32xf32>
    %262 = math.tanh %261 : vector<4x32xf32>
    %263 = arith.subf %232, %262 : vector<4x32xf32>
    %264 = arith.mulf %255, %263 : vector<4x32xf32>
    %265 = arith.addf %262, %264 : vector<4x32xf32>
    %266 = arith.truncf %265 : vector<4x32xf32> to vector<4x32xbf16>
    %267 = arith.index_cast %c7_i32 : i32 to index
    %c0_54 = arith.constant 0 : index
    %c0_55 = arith.constant 0 : index
    %268 = vector.load %arg6[%267, %c0_54, %c0_55] : memref<8x4x32xbf16, #tpu.memory_space<vmem>>, vector<1x4x32xbf16>
    %269 = vector.shape_cast %268 : vector<1x4x32xbf16> to vector<4x32xbf16>
    %270 = vector.shape_cast %266 : vector<4x32xbf16> to vector<1x4x32xbf16>
    tpu.vector_store %arg6[%267, %c0_54, %c0_55], %270 {strides = array<i32>} : memref<8x4x32xbf16, #tpu.memory_space<vmem>>, vector<1x4x32xbf16>,
    %c8_i32 = arith.constant 8 : i32
    %c0_56 = arith.constant 0 : index
    %c0_57 = arith.constant 0 : index
    %271 = vector.load %arg7[%c0_56, %c0_57] : memref<4x32xf32, #tpu.memory_space<vmem>>, vector<4x32xf32>
    tpu.vector_store %arg7[%c0_56, %c0_57], %265 {strides = array<i32>} : memref<4x32xf32, #tpu.memory_space<vmem>>, vector<4x32xf32>,
    return
  }
  func.func @transform_0(%arg0: i32, %arg1: i32) -> (i32, i32, i32) {
    %c1_i32 = arith.constant 1 : i32
    %0 = arith.muli %arg0, %c1_i32 : i32
    %1 = arith.addi %0, %arg1 : i32
    %c0_i32 = arith.constant 0 : i32
    %c0_i32_0 = arith.constant 0 : i32
    %c0_i32_1 = arith.constant 0 : i32
    return %1, %c0_i32, %c0_i32_0 : i32, i32, i32
  }
  func.func @transform_1(%arg0: i32, %arg1: i32) -> (i32, i32) {
    %c0_i32 = arith.constant 0 : i32
    %c0_i32_0 = arith.constant 0 : i32
    %c0_i32_1 = arith.constant 0 : i32
    return %c0_i32, %c0_i32_0 : i32, i32
  }
  func.func @transform_2(%arg0: i32, %arg1: i32) -> (i32, i32) {
    %c0_i32 = arith.constant 0 : i32
    %c0_i32_0 = arith.constant 0 : i32
    %c0_i32_1 = arith.constant 0 : i32
    return %c0_i32, %c0_i32_0 : i32, i32
  }
  func.func @transform_4(%arg0: i32, %arg1: i32) -> (i32, i32, i32) {
    %c1_i32 = arith.constant 1 : i32
    %0 = arith.muli %arg0, %c1_i32 : i32
    %1 = arith.addi %0, %arg1 : i32
    %c0_i32 = arith.constant 0 : i32
    %c0_i32_0 = arith.constant 0 : i32
    %c0_i32_1 = arith.constant 0 : i32
    return %1, %c0_i32, %c0_i32_0 : i32, i32, i32
  }
}

</mosaic_0001>

<bundles_post_ra>
// kernel: gru_forward.2
= control target key start
LH: loop header
LB: loop body
LE: loop exit
PB: predicated region body
PF: predicated region fallthrough
CT: control target
= control target key end

     0   :  { %vm56_vm0 = vcmask 257024   ;;  %v1094_v0 = vmov 0.0   ;;  %s1350_s0 = inlined_call_operand.vmem [shape: bf16[8,4,96], index: 0, kind: input, shape index: {}]   ;;  %s1351_s1 = inlined_call_operand.vmem [shape: f32[1,96], index: 1, kind: input, shape index: {}]   ;;  %s1352_s2 = inlined_call_operand.vmem [shape: f32[1,32], index: 2, kind: input, shape index: {}]   ;;  %s1353_s3 = inlined_call_operand.vmem [shape: bf16[32,96], index: 3, kind: input, shape index: {}]   ;;  %s1354_s4 = inlined_call_operand.vmem [shape: bf16[8,4,32], index: 4, kind: output, shape index: {}]  }
   0x1   :  { %57 = vst.msk [vmem:[#allocation2] sm:$0xf] %vm56_vm0, %v1094_v0 }
   0x2   :  { %v1130_v1 = vld [vmem:[%s1353_s3] sm:$0xff]  ;;  %v1135_v2 = vld [vmem:[%s1353_s3 + $0x8] sm:$0xff] }
   0x3   :  { %101 = vsyncadd [#allocation4], 256 }
   0x4   :  { %1092 = dma.done.wait [#allocation4], 256 }
   0x5   :  { %1093 = vsyncadd [#allocation4], 4294967040  ;;  %974 = vmatprep.subr.bf16.mxu0 %v1094_v0  ;;  %v921_v3 = vld [vmem:[%s1352_s2] ss:$0 sm:$0xff]  ;;  %982 = vmatprep.subr.bf16.mxu1 %v1094_v0  ;;  %vm1095_vm1 = vmmov 0   ;;  %s1096_s3 = smov 64  }
   0x6   :  { %975 = vmatpush3.bf16.msra.mxu0 %v1130_v1  ;;  %978 = vmatprep.mubr.msk.bf16.mxu0 %vm1095_vm1, %v1094_v0  ;;  %vm121_vm2 = vcmask 261120   ;;  %v111_v12 = vld [vmem:[%s1350_s0] sm:$0x3]  ;;  %v922_v39 = vld [vmem:[%s1350_s0 + $0x2] sm:$0x3]  ;;  %s1098_s26 = smov 96  }
   0x7   :  { %976 = vmatprep.subr.bf16.mxu0 %v1094_v0  ;;  %177 = vrot.lane.b32.xlu0 %v921_v3, %s1096_s3  ;;  %v112_v13 = vunpack.c.l.bf16 %v111_v12  ;;  %v1172_v14 = vld [vmem:[%s1351_s1] ss:$0 sm:$0xff]  ;;  %s1097_s1 = smov 32   ;;  %v223_v40 = vunpack.c.l.bf16 %v922_v39  ;;  %v926_v3 = vld [vmem:[%s1350_s0 + $0x4] sm:$0x3]  ;;  %vm219_vm3 = vcmask 254976  }
   0x8   :  { %v110_v4 = vld [vmem:[#allocation2] sm:$0xf]  ;;  %983 = vmatpush3.bf16.msra.mxu1 %v1130_v1  ;;  %986 = vmatprep.mubr.msk.bf16.mxu1 %vm1095_vm1, %v1094_v0 }
   0x9   :  { %v120_v5 = vpack.c.bf16 %v110_v4, %v110_v4  ;;  %984 = vmatprep.subr.bf16.mxu1 %v1094_v0  ;;  %v119_v15 = vadd.f32 %v1172_v14, %v112_v13  ;;  %v224_v41 = vadd.f32 %v1172_v14, %v223_v40 }
   0xa   :  { %977 = vmatpush3.bf16.msra.mxu0 %v1135_v2 }
   0xb   :  { %990 = vmatprep.subr.bf16.mxu0 %v1094_v0 }
   0xc   :  { %985 = vmatpush3.bf16.msra.mxu1 %v1135_v2 }
   0xd   :  { %979 = vmatmul.mubr.msk.bf16.vlgmr.msra.gmra.mrb[0].mxu0 %vm121_vm2, %v120_v5  ;;  %998 = vmatprep.subr.bf16.mxu1 %v1094_v0 }
   0xe   :  { %991 = vmatpush3.bf16.msra.mxu0 %v1130_v1  ;;  %994 = vmatprep.mubr.msk.bf16.mxu0 %vm1095_vm1, %v1094_v0 }
   0xf   :  { %992 = vmatprep.subr.bf16.mxu0 %v1094_v0 }
  0x12   :  { %993 = vmatpush3.bf16.msra.mxu0 %v1135_v2 }
  0x13   :  { %1006 = vmatprep.subr.bf16.mxu0 %v1094_v0 }
  0x79   :  { %v1162_v6 = vpop.permute.xlu0 %177 }
  0xe0   :  { %v159_v7 = vpop.f32.mrb[0].mxu0 }
  0xe1   :  { %v980_v8 = vpop.f32.mrb[1].mxu0  ;;  %v180_v9 = vadd.f32 %v1162_v6, %v159_v7  ;;  %v165_v16 = vadd.f32 %v159_v7, %v119_v15 }
  0xe2   :  { %v162_v10 = vpop.f32.mrb[2].mxu0 }
  0xe3   :  { %v981_v11 = vpop.f32.mrb[3].mxu0  ;;  %182 = vrot.lane.b32.xlu0 %v180_v9, %s1096_s3  ;;  %v920_v17 = vmul.f32 -1.442695, %v165_v16 }
  0xe5   :  { %1044 = vpow2.f32 %v920_v17 }
  0xef   :  { %v1045_v18 = vpop.eup %1044 }
  0xf0   :  { %v169_v19 = vadd.f32 1.0, %v1045_v18 }
  0xf2   :  { %1046 = vrcp.f32 %v169_v19 }
  0xfc   :  { %v1047_v20 = vpop.eup %1046 }
 0x155   :  { %v183_v21 = vpop.permute.xlu0 %182 }
 0x156   :  { %v185_v22 = vmul.f32 %v1047_v20, %v183_v21 }
 0x158   :  { %187 = vrot.lane.b32.xlu1 %v185_v22, %s1096_s3 }
 0x1ca   :  { %v188_v23 = vpop.permute.xlu1 %187 }
 0x1cb   :  { %v190_v24 = vadd.f32 %v188_v23, %v119_v15 }
 0x1cd   :  { %1048 = vtanh.f32 %v190_v24 }
 0x1d7   :  { %v1049_v25 = vpop.eup %1048 }
 0x1d8   :  { %193 = vrot.lane.b32.xlu1 %v1049_v25, %s1096_s3 }
 0x24a   :  { %v194_v26 = vpop.permute.xlu1 %193 }
 0x24b   :  { %v196_v27 = vsub.f32 %v110_v4, %v194_v26  ;;  %v316_v4 = vunpack.c.l.bf16 %v926_v3 }
 0x24d   :  { %198 = vrot.lane.b32.xlu0 %v196_v27, %s1097_s1  ;;  %v317_v5 = vadd.f32 %v1172_v14, %v316_v4 }
 0x2bf   :  { %v199_v28 = vpop.permute.xlu0 %198 }
 0x2c0   :  { %v201_v29 = vmul.f32 %v1047_v20, %v199_v28 }
 0x2c2   :  { %203 = vrot.lane.b32.xlu1 %v201_v29, %s1097_s1 }
 0x334   :  { %v204_v30 = vpop.permute.xlu1 %203 }
 0x335   :  { %v206_v31 = vadd.f32 %v1049_v25, %v204_v30  ;;  %v930_v30 = vld [vmem:[%s1350_s0 + $0x6] sm:$0x3] }
 0x337   :  { %v1179_v32 = vpack.c.bf16 %v206_v31, %v206_v31 }
 0x339   :  { %225 = vrot.lane.b32.xlu0 %v1179_v32, %s1096_s3 }
 0x3ab   :  { %v226_v33 = vpop.permute.xlu0 %225 }
 0x3ac   :  { %987 = vmatmul.mubr.msk.bf16.vlgmr.msra.gmra.mrb[0].mxu1 %vm121_vm2, %v226_v33 }
 0x3ad   :  { %999 = vmatpush3.bf16.msra.mxu1 %v1130_v1  ;;  %1002 = vmatprep.mubr.msk.bf16.mxu1 %vm1095_vm1, %v1094_v0 }
 0x3ae   :  { %1000 = vmatprep.subr.bf16.mxu1 %v1094_v0 }
 0x3b1   :  { %1001 = vmatpush3.bf16.msra.mxu1 %v1135_v2 }
 0x3b2   :  { %1014 = vmatprep.subr.bf16.mxu1 %v1094_v0 }
 0x47f   :  { %v264_v34 = vpop.f32.mrb[0].mxu1 }
 0x480   :  { %v277_v35 = vadd.f32 %v264_v34, %v1162_v6  ;;  %v988_v36 = vpop.f32.mrb[1].mxu1  ;;  %v270_v42 = vadd.f32 %v264_v34, %v224_v41 }
 0x481   :  { %v267_v37 = vpop.f32.mrb[2].mxu1 }
 0x482   :  { %279 = vrot.lane.b32.xlu1 %v277_v35, %s1096_s3  ;;  %v989_v38 = vpop.f32.mrb[3].mxu1  ;;  %v924_v43 = vmul.f32 -1.442695, %v270_v42 }
 0x484   :  { %1050 = vpow2.f32 %v924_v43 }
 0x48e   :  { %v1051_v44 = vpop.eup %1050 }
 0x48f   :  { %v274_v45 = vadd.f32 1.0, %v1051_v44 }
 0x491   :  { %1052 = vrcp.f32 %v274_v45 }
 0x49b   :  { %v1053_v46 = vpop.eup %1052 }
 0x4f4   :  { %v280_v47 = vpop.permute.xlu1 %279 }
 0x4f5   :  { %v282_v48 = vmul.f32 %v1053_v46, %v280_v47 }
 0x4f7   :  { %284 = vrot.lane.b32.xlu0 %v282_v48, %s1096_s3 }
 0x569   :  { %v285_v49 = vpop.permute.xlu0 %284 }
 0x56a   :  { %v287_v50 = vadd.f32 %v285_v49, %v224_v41 }
 0x56c   :  { %1054 = vtanh.f32 %v287_v50 }
 0x576   :  { %v1055_v51 = vpop.eup %1054 }
 0x577   :  { %v289_v52 = vsub.f32 %v206_v31, %v1055_v51  ;;  %v409_v31 = vunpack.c.l.bf16 %v930_v30 }
 0x579   :  { %291 = vrot.lane.b32.xlu1 %v289_v52, %s1098_s26  ;;  %v410_v33 = vadd.f32 %v1172_v14, %v409_v31 }
 0x5eb   :  { %v292_v53 = vpop.permute.xlu1 %291 }
 0x5ec   :  { %v294_v54 = vmul.f32 %v1053_v46, %v292_v53 }
 0x5ee   :  { %296 = vrot.lane.b32.xlu0 %v294_v54, %s1097_s1 }
 0x660   :  { %v297_v55 = vpop.permute.xlu0 %296 }
 0x661   :  { %v299_v56 = vadd.f32 %v1055_v51, %v297_v55 }
 0x663   :  { %v1199_v57 = vpack.c.bf16 %v299_v56, %v299_v56 }
 0x665   :  { %318 = vrot.lane.b32.xlu1 %v1199_v57, %s1096_s3 }
 0x6d7   :  { %v319_v58 = vpop.permute.xlu1 %318 }
 0x6d8   :  { %995 = vmatmul.mubr.msk.bf16.vlgmr.msra.gmra.mrb[4].mxu0 %vm121_vm2, %v319_v58 }
 0x6d9   :  { %1007 = vmatpush3.bf16.msra.mxu0 %v1130_v1  ;;  %1010 = vmatprep.mubr.msk.bf16.mxu0 %vm1095_vm1, %v1094_v0 }
 0x6da   :  { %1008 = vmatprep.subr.bf16.mxu0 %v1094_v0 }
 0x6dd   :  { %1009 = vmatpush3.bf16.msra.mxu0 %v1135_v2 }
 0x6de   :  { %1022 = vmatprep.subr.bf16.mxu0 %v1094_v0 }
 0x7ab   :  { %v357_v59 = vpop.f32.mrb[4].mxu0 }
 0x7ac   :  { %v370_v60 = vadd.f32 %v357_v59, %v1162_v6  ;;  %v996_v61 = vpop.f32.mrb[5].mxu0  ;;  %v363_v7 = vadd.f32 %v357_v59, %v317_v5 }
 0x7ad   :  { %v360_v62 = vpop.f32.mrb[6].mxu0 }
 0x7ae   :  { %372 = vrot.lane.b32.xlu0 %v370_v60, %s1096_s3  ;;  %v997_v63 = vpop.f32.mrb[7].mxu0  ;;  %v928_v8 = vmul.f32 -1.442695, %v363_v7 }
 0x7b0   :  { %1056 = vpow2.f32 %v928_v8 }
 0x7ba   :  { %v1057_v9 = vpop.eup %1056 }
 0x7bb   :  { %v367_v10 = vadd.f32 1.0, %v1057_v9 }
 0x7bd   :  { %1058 = vrcp.f32 %v367_v10 }
 0x7c7   :  { %v1059_v11 = vpop.eup %1058 }
 0x820   :  { %v373_v12 = vpop.permute.xlu0 %372 }
 0x821   :  { %v375_v13 = vmul.f32 %v1059_v11, %v373_v12 }
 0x823   :  { %377 = vrot.lane.b32.xlu1 %v375_v13, %s1096_s3 }
 0x895   :  { %v378_v15 = vpop.permute.xlu1 %377 }
 0x896   :  { %v380_v16 = vadd.f32 %v378_v15, %v317_v5 }
 0x898   :  { %1060 = vtanh.f32 %v380_v16 }
 0x8a2   :  { %v1061_v17 = vpop.eup %1060 }
 0x8a3   :  { %v382_v18 = vsub.f32 %v299_v56, %v1061_v17  ;;  %v934_v56 = vld [vmem:[%s1350_s0 + $0x8] sm:$0x3] }
 0x8a4   :  { %v502_v58 = vunpack.c.l.bf16 %v934_v56 }
 0x8a5   :  { %384 = vrot.lane.b32.xlu0 %v382_v18, %s1098_s26 }
 0x8a6   :  { %v503_v59 = vadd.f32 %v1172_v14, %v502_v58 }
 0x917   :  { %v385_v19 = vpop.permute.xlu0 %384 }
 0x918   :  { %v387_v20 = vmul.f32 %v1059_v11, %v385_v19 }
 0x91a   :  { %389 = vrot.lane.b32.xlu1 %v387_v20, %s1097_s1 }
 0x98c   :  { %v390_v21 = vpop.permute.xlu1 %389 }
 0x98d   :  { %v392_v22 = vadd.f32 %v1061_v17, %v390_v21 }
 0x98f   :  { %v1219_v23 = vpack.c.bf16 %v392_v22, %v392_v22 }
 0x991   :  { %411 = vrot.lane.b32.xlu0 %v1219_v23, %s1096_s3 }
 0xa03   :  { %v412_v24 = vpop.permute.xlu0 %411 }
 0xa04   :  { %1003 = vmatmul.mubr.msk.bf16.vlgmr.msra.gmra.mrb[4].mxu1 %vm121_vm2, %v412_v24  ;;  %v938_v24 = vld [vmem:[%s1350_s0 + $0xa] sm:$0x3] }
 0xa05   :  { %1015 = vmatpush3.bf16.msra.mxu1 %v1130_v1  ;;  %1018 = vmatprep.mubr.msk.bf16.mxu1 %vm1095_vm1, %v1094_v0 }
 0xa06   :  { %1016 = vmatprep.subr.bf16.mxu1 %v1094_v0 }
 0xa09   :  { %1017 = vmatpush3.bf16.msra.mxu1 %v1135_v2 }
 0xa0a   :  { %1030 = vmatprep.subr.bf16.mxu1 %v1094_v0 }
 0xad7   :  { %v450_v25 = vpop.f32.mrb[4].mxu1 }
 0xad8   :  { %v463_v26 = vadd.f32 %v450_v25, %v1162_v6  ;;  %v1004_v27 = vpop.f32.mrb[5].mxu1  ;;  %v456_v34 = vadd.f32 %v450_v25, %v410_v33 }
 0xad9   :  { %v453_v28 = vpop.f32.mrb[6].mxu1 }
 0xada   :  { %465 = vrot.lane.b32.xlu1 %v463_v26, %s1096_s3  ;;  %v1005_v29 = vpop.f32.mrb[7].mxu1  ;;  %v932_v35 = vmul.f32 -1.442695, %v456_v34 }
 0xadc   :  { %1062 = vpow2.f32 %v932_v35 }
 0xae6   :  { %v1063_v36 = vpop.eup %1062 }
 0xae7   :  { %v460_v37 = vadd.f32 1.0, %v1063_v36 }
 0xae9   :  { %1064 = vrcp.f32 %v460_v37 }
 0xaf3   :  { %v1065_v38 = vpop.eup %1064 }
 0xb4c   :  { %v466_v39 = vpop.permute.xlu1 %465 }
 0xb4d   :  { %v468_v40 = vmul.f32 %v1065_v38, %v466_v39 }
 0xb4f   :  { %470 = vrot.lane.b32.xlu0 %v468_v40, %s1096_s3 }
 0xbc1   :  { %v471_v41 = vpop.permute.xlu0 %470 }
 0xbc2   :  { %v473_v42 = vadd.f32 %v471_v41, %v410_v33 }
 0xbc4   :  { %1066 = vtanh.f32 %v473_v42 }
 0xbce   :  { %v1067_v43 = vpop.eup %1066 }
 0xbcf   :  { %v475_v44 = vsub.f32 %v392_v22, %v1067_v43 }
 0xbd1   :  { %477 = vrot.lane.b32.xlu1 %v475_v44, %s1098_s26 }
 0xc43   :  { %v478_v45 = vpop.permute.xlu1 %477 }
 0xc44   :  { %v480_v46 = vmul.f32 %v1065_v38, %v478_v45 }
 0xc46   :  { %482 = vrot.lane.b32.xlu0 %v480_v46, %s1097_s1 }
 0xcb8   :  { %v483_v47 = vpop.permute.xlu0 %482 }
 0xcb9   :  { %v485_v48 = vadd.f32 %v1067_v43, %v483_v47  ;;  %v942_v47 = vld [vmem:[%s1350_s0 + $0xc] sm:$0x3] }
 0xcbb   :  { %v1239_v49 = vpack.c.bf16 %v485_v48, %v485_v48 }
 0xcbd   :  { %504 = vrot.lane.b32.xlu1 %v1239_v49, %s1096_s3 }
 0xd2f   :  { %v505_v50 = vpop.permute.xlu1 %504 }
 0xd30   :  { %1011 = vmatmul.mubr.msk.bf16.vlgmr.msra.gmra.mrb[8].mxu0 %vm121_vm2, %v505_v50 }
 0xd31   :  { %1023 = vmatpush3.bf16.msra.mxu0 %v1130_v1  ;;  %1026 = vmatprep.mubr.msk.bf16.mxu0 %vm1095_vm1, %v1094_v0 }
 0xd32   :  { %1024 = vmatprep.subr.bf16.mxu0 %v1094_v0 }
 0xd35   :  { %1025 = vmatpush3.bf16.msra.mxu0 %v1135_v2 }
 0xe03   :  { %v543_v51 = vpop.f32.mrb[8].mxu0 }
 0xe04   :  { %v556_v52 = vadd.f32 %v543_v51, %v1162_v6  ;;  %v1012_v53 = vpop.f32.mrb[9].mxu0  ;;  %v549_v60 = vadd.f32 %v543_v51, %v503_v59 }
 0xe05   :  { %v546_v54 = vpop.f32.mrb[10].mxu0 }
 0xe06   :  { %558 = vrot.lane.b32.xlu0 %v556_v52, %s1096_s3  ;;  %v1013_v55 = vpop.f32.mrb[11].mxu0  ;;  %v936_v61 = vmul.f32 -1.442695, %v549_v60 }
 0xe08   :  { %1068 = vpow2.f32 %v936_v61 }
 0xe12   :  { %v1069_v62 = vpop.eup %1068 }
 0xe13   :  { %v553_v63 = vadd.f32 1.0, %v1069_v62 }
 0xe15   :  { %1070 = vrcp.f32 %v553_v63 }
 0xe1f   :  { %v1071_v3 = vpop.eup %1070 }
 0xe78   :  { %v559_v4 = vpop.permute.xlu0 %558 }
 0xe79   :  { %v561_v5 = vmul.f32 %v1071_v3, %v559_v4 }
 0xe7b   :  { %563 = vrot.lane.b32.xlu1 %v561_v5, %s1096_s3 }
 0xeed   :  { %v564_v7 = vpop.permute.xlu1 %563 }
 0xeee   :  { %v566_v8 = vadd.f32 %v564_v7, %v503_v59 }
 0xef0   :  { %1072 = vtanh.f32 %v566_v8 }
 0xefa   :  { %v1073_v9 = vpop.eup %1072 }
 0xefb   :  { %v568_v10 = vsub.f32 %v485_v48, %v1073_v9  ;;  %v688_v48 = vunpack.c.l.bf16 %v942_v47 }
 0xefd   :  { %570 = vrot.lane.b32.xlu0 %v568_v10, %s1098_s26  ;;  %v689_v50 = vadd.f32 %v1172_v14, %v688_v48 }
 0xf6f   :  { %v571_v11 = vpop.permute.xlu0 %570 }
 0xf70   :  { %v573_v12 = vmul.f32 %v1071_v3, %v571_v11 }
 0xf72   :  { %575 = vrot.lane.b32.xlu1 %v573_v12, %s1097_s1 }
 0xfe4   :  { %v576_v13 = vpop.permute.xlu1 %575 }
 0xfe5   :  { %v578_v15 = vadd.f32 %v1073_v9, %v576_v13 }
 0xfe7   :  { %v1258_v16 = vpack.c.bf16 %v578_v15, %v578_v15 }
 0xfe9   :  { %597 = vrot.lane.b32.xlu0 %v1258_v16, %s1096_s3 }
0x105b   :  { %v598_v17 = vpop.permute.xlu0 %597 }
0x105c   :  { %1019 = vmatmul.mubr.msk.bf16.vlgmr.msra.gmra.mrb[8].mxu1 %vm121_vm2, %v598_v17 }
0x105d   :  { %1031 = vmatpush3.bf16.msra.mxu1 %v1130_v1  ;;  %1034 = vmatprep.mubr.msk.bf16.mxu1 %vm1095_vm1, %v1094_v0  ;;  %v595_v1 = vunpack.c.l.bf16 %v938_v24 }
0x105e   :  { %1032 = vmatprep.subr.bf16.mxu1 %v1094_v0 }
0x105f   :  { %v596_v25 = vadd.f32 %v1172_v14, %v595_v1 }
0x1061   :  { %1033 = vmatpush3.bf16.msra.mxu1 %v1135_v2 }
0x112f   :  { %v636_v18 = vpop.f32.mrb[8].mxu1 }
0x1130   :  { %v649_v19 = vadd.f32 %v636_v18, %v1162_v6  ;;  %v1020_v20 = vpop.f32.mrb[9].mxu1  ;;  %v642_v26 = vadd.f32 %v636_v18, %v596_v25 }
0x1131   :  { %v639_v21 = vpop.f32.mrb[10].mxu1 }
0x1132   :  { %651 = vrot.lane.b32.xlu1 %v649_v19, %s1096_s3  ;;  %v1021_v22 = vpop.f32.mrb[11].mxu1  ;;  %v940_v27 = vmul.f32 -1.442695, %v642_v26 }
0x1134   :  { %1074 = vpow2.f32 %v940_v27  ;;  %v1099_v27 = vmov 1983009808  }
0x113e   :  { %v1075_v0 = vpop.eup %1074 }
0x113f   :  { %v646_v2 = vadd.f32 1.0, %v1075_v0  ;;  %v210_v0 = vunpack.c.l.s4 %v1099_v27 }
0x1141   :  { %1076 = vrcp.f32 %v646_v2  ;;  %v212_v2 = vlaneseq }
0x114b   :  { %v1077_v28 = vpop.eup %1076 }
0x11a4   :  { %v652_v29 = vpop.permute.xlu1 %651 }
0x11a5   :  { %v654_v30 = vmul.f32 %v1077_v28, %v652_v29  ;;  %v213_v29 = vshrl.u32 %v212_v2, 7 }
0x11a7   :  { %656 = vrot.lane.b32.xlu0 %v654_v30, %s1096_s3 }
0x1219   :  { %v657_v31 = vpop.permute.xlu0 %656 }
0x121a   :  { %v659_v33 = vadd.f32 %v657_v31, %v596_v25 }
0x121c   :  { %1078 = vtanh.f32 %v659_v33 }
0x1226   :  { %v1079_v34 = vpop.eup %1078 }
0x1227   :  { %v661_v35 = vsub.f32 %v578_v15, %v1079_v34  ;;  %v946_v15 = vld [vmem:[%s1350_s0 + $0xe] sm:$0x3] }
0x1228   :  { %v781_v17 = vunpack.c.l.bf16 %v946_v15 }
0x1229   :  { %663 = vrot.lane.b32.xlu1 %v661_v35, %s1098_s26 }
0x122a   :  { %v782_v18 = vadd.f32 %v1172_v14, %v781_v17 }
0x129b   :  { %v664_v36 = vpop.permute.xlu1 %663 }
0x129c   :  { %v666_v37 = vmul.f32 %v1077_v28, %v664_v36  ;;  %v211_v28 = vunpack.c.0.s8 %v210_v0 }
0x129e   :  { %668 = vrot.lane.b32.xlu0 %v666_v37, %s1097_s1  ;;  %v214_v31 = vsub.s32 %v211_v28, %v213_v29 }
0x12a0   :  { %v215_v33 = vrot.slane %v1179_v32, %v214_v31  ;;  %v587_v35 = vrot.slane %v1258_v16, %v214_v31  ;;  %v308_v32 = vrot.slane %v1199_v57, %v214_v31  ;;  %v494_v16 = vrot.slane %v1239_v49, %v214_v31 }
0x1310   :  { %v669_v38 = vpop.permute.xlu0 %668 }
0x1311   :  { %v671_v39 = vadd.f32 %v1079_v34, %v669_v38  ;;  %v401_v34 = vrot.slane %v1219_v23, %v214_v31 }
0x1313   :  { %v1277_v40 = vpack.c.bf16 %v671_v39, %v671_v39 }
0x1315   :  { %690 = vrot.lane.b32.xlu1 %v1277_v40, %s1096_s3  ;;  %v680_v57 = vrot.slane %v1277_v40, %v214_v31 }
0x1387   :  { %v691_v41 = vpop.permute.xlu1 %690 }
0x1388   :  { %1027 = vmatmul.mubr.msk.bf16.vlgmr.msra.gmra.mrb[12].mxu0 %vm121_vm2, %v691_v41 }
0x145b   :  { %v729_v42 = vpop.f32.mrb[12].mxu0 }
0x145c   :  { %v742_v43 = vadd.f32 %v729_v42, %v1162_v6  ;;  %v1028_v44 = vpop.f32.mrb[13].mxu0  ;;  %v735_v51 = vadd.f32 %v729_v42, %v689_v50 }
0x145d   :  { %v732_v45 = vpop.f32.mrb[14].mxu0 }
0x145e   :  { %744 = vrot.lane.b32.xlu0 %v742_v43, %s1096_s3  ;;  %v1029_v46 = vpop.f32.mrb[15].mxu0  ;;  %v944_v52 = vmul.f32 -1.442695, %v735_v51 }
0x1460   :  { %1080 = vpow2.f32 %v944_v52 }
0x146a   :  { %v1081_v53 = vpop.eup %1080 }
0x146b   :  { %v739_v54 = vadd.f32 1.0, %v1081_v53 }
0x146d   :  { %1082 = vrcp.f32 %v739_v54 }
0x1477   :  { %v1083_v55 = vpop.eup %1082 }
0x14d0   :  { %v745_v56 = vpop.permute.xlu0 %744 }
0x14d1   :  { %v747_v58 = vmul.f32 %v1083_v55, %v745_v56 }
0x14d3   :  { %749 = vrot.lane.b32.xlu1 %v747_v58, %s1096_s3 }
0x1545   :  { %v750_v59 = vpop.permute.xlu1 %749 }
0x1546   :  { %v752_v60 = vadd.f32 %v750_v59, %v689_v50 }
0x1548   :  { %1084 = vtanh.f32 %v752_v60 }
0x1552   :  { %v1085_v61 = vpop.eup %1084 }
0x1553   :  { %v754_v62 = vsub.f32 %v671_v39, %v1085_v61 }
0x1555   :  { %756 = vrot.lane.b32.xlu0 %v754_v62, %s1098_s26 }
0x15c7   :  { %v757_v63 = vpop.permute.xlu0 %756 }
0x15c8   :  { %v759_v3 = vmul.f32 %v1083_v55, %v757_v63 }
0x15ca   :  { %761 = vrot.lane.b32.xlu1 %v759_v3, %s1097_s1 }
0x163c   :  { %v762_v4 = vpop.permute.xlu1 %761 }
0x163d   :  { %v764_v5 = vadd.f32 %v1085_v61, %v762_v4 }
0x163f   :  { %v765_v7 = vpack.c.bf16 %v764_v5, %v764_v5 }
0x1641   :  { %783 = vrot.lane.b32.xlu0 %v765_v7, %s1096_s3  ;;  %v773_v36 = vrot.slane %v765_v7, %v214_v31 }
0x16b3   :  { %v784_v8 = vpop.permute.xlu0 %783 }
0x16b4   :  { %1035 = vmatmul.mubr.msk.bf16.vlgmr.msra.gmra.mrb[12].mxu1 %vm121_vm2, %v784_v8 }
0x1787   :  { %v822_v9 = vpop.f32.mrb[12].mxu1 }
0x1788   :  { %v835_v10 = vadd.f32 %v822_v9, %v1162_v6  ;;  %v1036_v11 = vpop.f32.mrb[13].mxu1  ;;  %v828_v19 = vadd.f32 %v822_v9, %v782_v18 }
0x1789   :  { %v825_v12 = vpop.f32.mrb[14].mxu1 }
0x178a   :  { %837 = vrot.lane.b32.xlu1 %v835_v10, %s1096_s3  ;;  %v1037_v13 = vpop.f32.mrb[15].mxu1  ;;  %v948_v20 = vmul.f32 -1.442695, %v828_v19 }
0x178c   :  { %1086 = vpow2.f32 %v948_v20 }
0x1796   :  { %v1087_v21 = vpop.eup %1086 }
0x1797   :  { %v832_v22 = vadd.f32 1.0, %v1087_v21 }
0x1799   :  { %1088 = vrcp.f32 %v832_v22 }
0x17a3   :  { %v1089_v24 = vpop.eup %1088 }
0x17fc   :  { %v838_v6 = vpop.permute.xlu1 %837 }
0x17fd   :  { %v840_v1 = vmul.f32 %v1089_v24, %v838_v6 }
0x17ff   :  { %842 = vrot.lane.b32.xlu0 %v840_v1, %s1096_s3 }
0x1871   :  { %v843_v25 = vpop.permute.xlu0 %842 }
0x1872   :  { %v845_v26 = vadd.f32 %v843_v25, %v782_v18 }
0x1874   :  { %1090 = vtanh.f32 %v845_v26 }
0x187e   :  { %v1091_v14 = vpop.eup %1090 }
0x187f   :  { %v847_v30 = vsub.f32 %v764_v5, %v1091_v14 }
0x1881   :  { %849 = vrot.lane.b32.xlu1 %v847_v30, %s1098_s26 }
0x1885   :  { %216 = vrot.lane.b32.xlu1 %v215_v33, %s1096_s3 }
0x1889   :  { %402 = vrot.lane.b32.xlu1 %v401_v34, %s1096_s3 }
0x188d   :  { %588 = vrot.lane.b32.xlu1 %v587_v35, %s1096_s3 }
0x1891   :  { %774 = vrot.lane.b32.xlu1 %v773_v36, %s1096_s3 }
0x18f3   :  { %v850_v37 = vpop.permute.xlu1 %849 }
0x18f4   :  { %v852_v38 = vmul.f32 %v1089_v24, %v850_v37 }
0x18f6   :  { %854 = vrot.lane.b32.xlu0 %v852_v38, %s1097_s1 }
0x18f7   :  { %v217_v39 = vpop.permute.xlu1 %216 }
0x18f8   :  { %220 = vst.msk [vmem:[%s1354_s4] sm:$0x3] %vm219_vm3, %v217_v39 }
0x18fa   :  { %309 = vrot.lane.b32.xlu0 %v308_v32, %s1096_s3 }
0x18fb   :  { %v403_v23 = vpop.permute.xlu1 %402 }
0x18fc   :  { %929 = vst.msk [vmem:[%s1354_s4 + $0x4] sm:$0x3] %vm219_vm3, %v403_v23 }
0x18fe   :  { %495 = vrot.lane.b32.xlu0 %v494_v16, %s1096_s3 }
0x18ff   :  { %v589_v41 = vpop.permute.xlu1 %588 }
0x1900   :  { %937 = vst.msk [vmem:[%s1354_s4 + $0x8] sm:$0x3] %vm219_vm3, %v589_v41 }
0x1902   :  { %681 = vrot.lane.b32.xlu0 %v680_v57, %s1096_s3 }
0x1903   :  { %v775_v42 = vpop.permute.xlu1 %774 }
0x1904   :  { %945 = vst.msk [vmem:[%s1354_s4 + $0xc] sm:$0x3] %vm219_vm3, %v775_v42 }
0x1968   :  { %v855_v43 = vpop.permute.xlu0 %854 }
0x1969   :  { %v857_v49 = vadd.f32 %v1091_v14, %v855_v43 }
0x196b   :  { %v858_v44 = vpack.c.bf16 %v857_v49, %v857_v49  ;;  %873 = vrot.lane.b32.xlu1 %v857_v49, %s1096_s3 }
0x196c   :  { %v310_v45 = vpop.permute.xlu0 %309 }
0x196d   :  { %925 = vst.msk [vmem:[%s1354_s4 + $0x2] sm:$0x3] %vm219_vm3, %v310_v45  ;;  %v866_v40 = vrot.slane %v858_v44, %v214_v31 }
0x196f   :  { %867 = vrot.lane.b32.xlu0 %v866_v40, %s1096_s3 }
0x1970   :  { %v496_v46 = vpop.permute.xlu0 %495 }
0x1971   :  { %933 = vst.msk [vmem:[%s1354_s4 + $0x6] sm:$0x3] %vm219_vm3, %v496_v46 }
0x1974   :  { %v682_v47 = vpop.permute.xlu0 %681 }
0x1975   :  { %941 = vst.msk [vmem:[%s1354_s4 + $0xa] sm:$0x3] %vm219_vm3, %v682_v47 }
0x19dd   :  { %v874_v48 = vpop.permute.xlu1 %873 }
0x19de   :  { %877 = vst.msk [vmem:[#allocation2] sm:$0xf] %vm56_vm0, %v874_v48 }
0x19e1   :  { %v868_v50 = vpop.permute.xlu0 %867 }
0x19e2   :  { %949 = vst.msk [vmem:[%s1354_s4 + $0xe] sm:$0x3] %vm219_vm3, %v868_v50 }

// kernel: gru_forward.3
= control target key start
LH: loop header
LB: loop body
LE: loop exit
PB: predicated region body
PF: predicated region fallthrough
CT: control target
= control target key end

     0   :  { %9 = vsyncpa [#allocation5], 0  ;;  %vm43_vm0 = vcmask 257024   ;;  %v992_v0 = vmov 0.0   ;;  %s1197_s0 = inlined_call_operand.vmem [shape: bf16[8,4,96], index: 0, kind: input, shape index: {}]   ;;  %s1198_s1 = inlined_call_operand.vmem [shape: f32[1,96], index: 1, kind: input, shape index: {}]   ;;  %s1199_s2 = inlined_call_operand.vmem [shape: f32[1,32], index: 2, kind: input, shape index: {}]   ;;  %s1200_s3 = inlined_call_operand.vmem [shape: bf16[32,96], index: 3, kind: input, shape index: {}]   ;;  %s1201_s4 = inlined_call_operand.hbm [shape: f32[4,32], index: 4, kind: output, shape index: {}]  }
   0x1   :  { %44 = vst.msk [vmem:[#allocation2] sm:$0xf] %vm43_vm0, %v992_v0 }
   0x2   :  { %v1028_v1 = vld [vmem:[%s1200_s3] sm:$0xff]  ;;  %v1033_v2 = vld [vmem:[%s1200_s3 + $0x8] sm:$0xff] }
   0x3   :  { %88 = vsyncadd [#allocation6], 256 }
   0x4   :  { %988 = dma.done.wait [#allocation6], 256 }
   0x5   :  { %989 = vsyncadd [#allocation6], 4294967040  ;;  %848 = vmatprep.subr.bf16.mxu0 %v992_v0  ;;  %v802_v3 = vld [vmem:[%s1199_s2] ss:$0 sm:$0xff]  ;;  %856 = vmatprep.subr.bf16.mxu1 %v992_v0  ;;  %vm993_vm1 = vmmov 0   ;;  %s994_s3 = smov 64  }
   0x6   :  { %849 = vmatpush3.bf16.msra.mxu0 %v1028_v1  ;;  %852 = vmatprep.mubr.msk.bf16.mxu0 %vm993_vm1, %v992_v0  ;;  %vm108_vm2 = vcmask 261120   ;;  %v98_v12 = vld [vmem:[%s1197_s0] sm:$0x3]  ;;  %v803_v39 = vld [vmem:[%s1197_s0 + $0x2] sm:$0x3]  ;;  %s996_s26 = smov 96  }
   0x7   :  { %850 = vmatprep.subr.bf16.mxu0 %v992_v0  ;;  %164 = vrot.lane.b32.xlu0 %v802_v3, %s994_s3  ;;  %v99_v13 = vunpack.c.l.bf16 %v98_v12  ;;  %v1070_v14 = vld [vmem:[%s1198_s1] ss:$0 sm:$0xff]  ;;  %s995_s1 = smov 32   ;;  %v196_v40 = vunpack.c.l.bf16 %v803_v39  ;;  %v806_v3 = vld [vmem:[%s1197_s0 + $0x4] sm:$0x3] }
   0x8   :  { %v97_v4 = vld [vmem:[#allocation2] sm:$0xf]  ;;  %857 = vmatpush3.bf16.msra.mxu1 %v1028_v1  ;;  %860 = vmatprep.mubr.msk.bf16.mxu1 %vm993_vm1, %v992_v0 }
   0x9   :  { %v107_v5 = vpack.c.bf16 %v97_v4, %v97_v4  ;;  %858 = vmatprep.subr.bf16.mxu1 %v992_v0  ;;  %v106_v15 = vadd.f32 %v1070_v14, %v99_v13  ;;  %v197_v41 = vadd.f32 %v1070_v14, %v196_v40 }
   0xa   :  { %851 = vmatpush3.bf16.msra.mxu0 %v1033_v2 }
   0xb   :  { %864 = vmatprep.subr.bf16.mxu0 %v992_v0 }
   0xc   :  { %859 = vmatpush3.bf16.msra.mxu1 %v1033_v2 }
   0xd   :  { %853 = vmatmul.mubr.msk.bf16.vlgmr.msra.gmra.mrb[0].mxu0 %vm108_vm2, %v107_v5  ;;  %872 = vmatprep.subr.bf16.mxu1 %v992_v0 }
   0xe   :  { %865 = vmatpush3.bf16.msra.mxu0 %v1028_v1  ;;  %868 = vmatprep.mubr.msk.bf16.mxu0 %vm993_vm1, %v992_v0 }
   0xf   :  { %866 = vmatprep.subr.bf16.mxu0 %v992_v0 }
  0x12   :  { %867 = vmatpush3.bf16.msra.mxu0 %v1033_v2 }
  0x13   :  { %880 = vmatprep.subr.bf16.mxu0 %v992_v0 }
  0x79   :  { %v1060_v6 = vpop.permute.xlu0 %164 }
  0xe0   :  { %v146_v7 = vpop.f32.mrb[0].mxu0 }
  0xe1   :  { %v854_v8 = vpop.f32.mrb[1].mxu0  ;;  %v167_v9 = vadd.f32 %v1060_v6, %v146_v7  ;;  %v152_v16 = vadd.f32 %v146_v7, %v106_v15 }
  0xe2   :  { %v149_v10 = vpop.f32.mrb[2].mxu0 }
  0xe3   :  { %v855_v11 = vpop.f32.mrb[3].mxu0  ;;  %169 = vrot.lane.b32.xlu0 %v167_v9, %s994_s3  ;;  %v801_v17 = vmul.f32 -1.442695, %v152_v16 }
  0xe5   :  { %918 = vpow2.f32 %v801_v17 }
  0xef   :  { %v919_v18 = vpop.eup %918 }
  0xf0   :  { %v156_v19 = vadd.f32 1.0, %v919_v18 }
  0xf2   :  { %920 = vrcp.f32 %v156_v19 }
  0xfc   :  { %v921_v20 = vpop.eup %920 }
 0x155   :  { %v170_v21 = vpop.permute.xlu0 %169 }
 0x156   :  { %v172_v22 = vmul.f32 %v921_v20, %v170_v21 }
 0x158   :  { %174 = vrot.lane.b32.xlu1 %v172_v22, %s994_s3 }
 0x1ca   :  { %v175_v23 = vpop.permute.xlu1 %174 }
 0x1cb   :  { %v177_v24 = vadd.f32 %v175_v23, %v106_v15 }
 0x1cd   :  { %922 = vtanh.f32 %v177_v24 }
 0x1d7   :  { %v923_v25 = vpop.eup %922 }
 0x1d8   :  { %180 = vrot.lane.b32.xlu1 %v923_v25, %s994_s3 }
 0x24a   :  { %v181_v26 = vpop.permute.xlu1 %180 }
 0x24b   :  { %v183_v27 = vsub.f32 %v97_v4, %v181_v26  ;;  %v277_v4 = vunpack.c.l.bf16 %v806_v3 }
 0x24d   :  { %185 = vrot.lane.b32.xlu0 %v183_v27, %s995_s1  ;;  %v278_v5 = vadd.f32 %v1070_v14, %v277_v4 }
 0x2bf   :  { %v186_v28 = vpop.permute.xlu0 %185 }
 0x2c0   :  { %v188_v29 = vmul.f32 %v921_v20, %v186_v28 }
 0x2c2   :  { %190 = vrot.lane.b32.xlu1 %v188_v29, %s995_s1 }
 0x334   :  { %v191_v30 = vpop.permute.xlu1 %190 }
 0x335   :  { %v193_v31 = vadd.f32 %v923_v25, %v191_v30  ;;  %v809_v30 = vld [vmem:[%s1197_s0 + $0x6] sm:$0x3] }
 0x337   :  { %v198_v32 = vpack.c.bf16 %v193_v31, %v193_v31 }
 0x339   :  { %200 = vrot.lane.b32.xlu0 %v198_v32, %s994_s3 }
 0x3ab   :  { %v201_v33 = vpop.permute.xlu0 %200 }
 0x3ac   :  { %861 = vmatmul.mubr.msk.bf16.vlgmr.msra.gmra.mrb[0].mxu1 %vm108_vm2, %v201_v33 }
 0x3ad   :  { %873 = vmatpush3.bf16.msra.mxu1 %v1028_v1  ;;  %876 = vmatprep.mubr.msk.bf16.mxu1 %vm993_vm1, %v992_v0 }
 0x3ae   :  { %874 = vmatprep.subr.bf16.mxu1 %v992_v0 }
 0x3b1   :  { %875 = vmatpush3.bf16.msra.mxu1 %v1033_v2 }
 0x3b2   :  { %888 = vmatprep.subr.bf16.mxu1 %v992_v0 }
 0x47f   :  { %v239_v34 = vpop.f32.mrb[0].mxu1 }
 0x480   :  { %v252_v35 = vadd.f32 %v239_v34, %v1060_v6  ;;  %v862_v36 = vpop.f32.mrb[1].mxu1  ;;  %v245_v42 = vadd.f32 %v239_v34, %v197_v41 }
 0x481   :  { %v242_v37 = vpop.f32.mrb[2].mxu1 }
 0x482   :  { %254 = vrot.lane.b32.xlu1 %v252_v35, %s994_s3  ;;  %v863_v38 = vpop.f32.mrb[3].mxu1  ;;  %v805_v43 = vmul.f32 -1.442695, %v245_v42 }
 0x484   :  { %924 = vpow2.f32 %v805_v43 }
 0x48e   :  { %v925_v44 = vpop.eup %924 }
 0x48f   :  { %v249_v45 = vadd.f32 1.0, %v925_v44 }
 0x491   :  { %926 = vrcp.f32 %v249_v45 }
 0x49b   :  { %v927_v46 = vpop.eup %926 }
 0x4f4   :  { %v255_v47 = vpop.permute.xlu1 %254 }
 0x4f5   :  { %v257_v48 = vmul.f32 %v927_v46, %v255_v47 }
 0x4f7   :  { %259 = vrot.lane.b32.xlu0 %v257_v48, %s994_s3 }
 0x569   :  { %v260_v49 = vpop.permute.xlu0 %259 }
 0x56a   :  { %v262_v50 = vadd.f32 %v260_v49, %v197_v41 }
 0x56c   :  { %928 = vtanh.f32 %v262_v50 }
 0x576   :  { %v929_v51 = vpop.eup %928 }
 0x577   :  { %v264_v52 = vsub.f32 %v193_v31, %v929_v51  ;;  %v358_v31 = vunpack.c.l.bf16 %v809_v30 }
 0x579   :  { %266 = vrot.lane.b32.xlu1 %v264_v52, %s996_s26  ;;  %v359_v32 = vadd.f32 %v1070_v14, %v358_v31 }
 0x5eb   :  { %v267_v53 = vpop.permute.xlu1 %266 }
 0x5ec   :  { %v269_v54 = vmul.f32 %v927_v46, %v267_v53 }
 0x5ee   :  { %271 = vrot.lane.b32.xlu0 %v269_v54, %s995_s1 }
 0x660   :  { %v272_v55 = vpop.permute.xlu0 %271 }
 0x661   :  { %v274_v56 = vadd.f32 %v929_v51, %v272_v55  ;;  %v812_v55 = vld [vmem:[%s1197_s0 + $0x8] sm:$0x3] }
 0x663   :  { %v279_v57 = vpack.c.bf16 %v274_v56, %v274_v56 }
 0x665   :  { %281 = vrot.lane.b32.xlu1 %v279_v57, %s994_s3 }
 0x6d7   :  { %v282_v58 = vpop.permute.xlu1 %281 }
 0x6d8   :  { %869 = vmatmul.mubr.msk.bf16.vlgmr.msra.gmra.mrb[4].mxu0 %vm108_vm2, %v282_v58 }
 0x6d9   :  { %881 = vmatpush3.bf16.msra.mxu0 %v1028_v1  ;;  %884 = vmatprep.mubr.msk.bf16.mxu0 %vm993_vm1, %v992_v0 }
 0x6da   :  { %882 = vmatprep.subr.bf16.mxu0 %v992_v0 }
 0x6dd   :  { %883 = vmatpush3.bf16.msra.mxu0 %v1033_v2 }
 0x6de   :  { %896 = vmatprep.subr.bf16.mxu0 %v992_v0 }
 0x7ab   :  { %v320_v59 = vpop.f32.mrb[4].mxu0 }
 0x7ac   :  { %v333_v60 = vadd.f32 %v320_v59, %v1060_v6  ;;  %v870_v61 = vpop.f32.mrb[5].mxu0  ;;  %v326_v7 = vadd.f32 %v320_v59, %v278_v5 }
 0x7ad   :  { %v323_v62 = vpop.f32.mrb[6].mxu0 }
 0x7ae   :  { %335 = vrot.lane.b32.xlu0 %v333_v60, %s994_s3  ;;  %v871_v63 = vpop.f32.mrb[7].mxu0  ;;  %v808_v8 = vmul.f32 -1.442695, %v326_v7 }
 0x7b0   :  { %930 = vpow2.f32 %v808_v8 }
 0x7ba   :  { %v931_v9 = vpop.eup %930 }
 0x7bb   :  { %v330_v10 = vadd.f32 1.0, %v931_v9 }
 0x7bd   :  { %932 = vrcp.f32 %v330_v10 }
 0x7c7   :  { %v933_v11 = vpop.eup %932 }
 0x820   :  { %v336_v12 = vpop.permute.xlu0 %335 }
 0x821   :  { %v338_v13 = vmul.f32 %v933_v11, %v336_v12 }
 0x823   :  { %340 = vrot.lane.b32.xlu1 %v338_v13, %s994_s3 }
 0x895   :  { %v341_v15 = vpop.permute.xlu1 %340 }
 0x896   :  { %v343_v16 = vadd.f32 %v341_v15, %v278_v5 }
 0x898   :  { %934 = vtanh.f32 %v343_v16 }
 0x8a2   :  { %v935_v17 = vpop.eup %934 }
 0x8a3   :  { %v345_v18 = vsub.f32 %v274_v56, %v935_v17  ;;  %v439_v56 = vunpack.c.l.bf16 %v812_v55 }
 0x8a5   :  { %347 = vrot.lane.b32.xlu0 %v345_v18, %s996_s26  ;;  %v440_v57 = vadd.f32 %v1070_v14, %v439_v56 }
 0x917   :  { %v348_v19 = vpop.permute.xlu0 %347 }
 0x918   :  { %v350_v20 = vmul.f32 %v933_v11, %v348_v19 }
 0x91a   :  { %352 = vrot.lane.b32.xlu1 %v350_v20, %s995_s1 }
 0x98c   :  { %v353_v21 = vpop.permute.xlu1 %352 }
 0x98d   :  { %v355_v22 = vadd.f32 %v935_v17, %v353_v21  ;;  %v815_v21 = vld [vmem:[%s1197_s0 + $0xa] sm:$0x3] }
 0x98f   :  { %v360_v23 = vpack.c.bf16 %v355_v22, %v355_v22 }
 0x991   :  { %362 = vrot.lane.b32.xlu0 %v360_v23, %s994_s3 }
 0xa03   :  { %v363_v24 = vpop.permute.xlu0 %362 }
 0xa04   :  { %877 = vmatmul.mubr.msk.bf16.vlgmr.msra.gmra.mrb[4].mxu1 %vm108_vm2, %v363_v24 }
 0xa05   :  { %889 = vmatpush3.bf16.msra.mxu1 %v1028_v1  ;;  %892 = vmatprep.mubr.msk.bf16.mxu1 %vm993_vm1, %v992_v0 }
 0xa06   :  { %890 = vmatprep.subr.bf16.mxu1 %v992_v0 }
 0xa09   :  { %891 = vmatpush3.bf16.msra.mxu1 %v1033_v2 }
 0xa0a   :  { %904 = vmatprep.subr.bf16.mxu1 %v992_v0 }
 0xad7   :  { %v401_v25 = vpop.f32.mrb[4].mxu1 }
 0xad8   :  { %v414_v26 = vadd.f32 %v401_v25, %v1060_v6  ;;  %v878_v27 = vpop.f32.mrb[5].mxu1  ;;  %v407_v33 = vadd.f32 %v401_v25, %v359_v32 }
 0xad9   :  { %v404_v28 = vpop.f32.mrb[6].mxu1 }
 0xada   :  { %416 = vrot.lane.b32.xlu1 %v414_v26, %s994_s3  ;;  %v879_v29 = vpop.f32.mrb[7].mxu1  ;;  %v811_v34 = vmul.f32 -1.442695, %v407_v33 }
 0xadc   :  { %936 = vpow2.f32 %v811_v34 }
 0xae6   :  { %v937_v35 = vpop.eup %936 }
 0xae7   :  { %v411_v36 = vadd.f32 1.0, %v937_v35 }
 0xae9   :  { %938 = vrcp.f32 %v411_v36 }
 0xaf3   :  { %v939_v37 = vpop.eup %938 }
 0xb4c   :  { %v417_v38 = vpop.permute.xlu1 %416 }
 0xb4d   :  { %v419_v39 = vmul.f32 %v939_v37, %v417_v38 }
 0xb4f   :  { %421 = vrot.lane.b32.xlu0 %v419_v39, %s994_s3 }
 0xbc1   :  { %v422_v40 = vpop.permute.xlu0 %421 }
 0xbc2   :  { %v424_v41 = vadd.f32 %v422_v40, %v359_v32 }
 0xbc4   :  { %940 = vtanh.f32 %v424_v41 }
 0xbce   :  { %v941_v42 = vpop.eup %940 }
 0xbcf   :  { %v426_v43 = vsub.f32 %v355_v22, %v941_v42 }
 0xbd1   :  { %428 = vrot.lane.b32.xlu1 %v426_v43, %s996_s26  ;;  %v818_v43 = vld [vmem:[%s1197_s0 + $0xc] sm:$0x3] }
 0xc43   :  { %v429_v44 = vpop.permute.xlu1 %428 }
 0xc44   :  { %v431_v45 = vmul.f32 %v939_v37, %v429_v44  ;;  %v601_v44 = vunpack.c.l.bf16 %v818_v43 }
 0xc46   :  { %433 = vrot.lane.b32.xlu0 %v431_v45, %s995_s1  ;;  %v602_v45 = vadd.f32 %v1070_v14, %v601_v44 }
 0xcb8   :  { %v434_v46 = vpop.permute.xlu0 %433 }
 0xcb9   :  { %v436_v47 = vadd.f32 %v941_v42, %v434_v46 }
 0xcbb   :  { %v441_v48 = vpack.c.bf16 %v436_v47, %v436_v47 }
 0xcbd   :  { %443 = vrot.lane.b32.xlu1 %v441_v48, %s994_s3 }
 0xd2f   :  { %v444_v49 = vpop.permute.xlu1 %443 }
 0xd30   :  { %885 = vmatmul.mubr.msk.bf16.vlgmr.msra.gmra.mrb[8].mxu0 %vm108_vm2, %v444_v49 }
 0xd31   :  { %897 = vmatpush3.bf16.msra.mxu0 %v1028_v1  ;;  %900 = vmatprep.mubr.msk.bf16.mxu0 %vm993_vm1, %v992_v0 }
 0xd32   :  { %898 = vmatprep.subr.bf16.mxu0 %v992_v0 }
 0xd35   :  { %899 = vmatpush3.bf16.msra.mxu0 %v1033_v2 }
 0xe03   :  { %v482_v50 = vpop.f32.mrb[8].mxu0 }
 0xe04   :  { %v495_v51 = vadd.f32 %v482_v50, %v1060_v6  ;;  %v886_v52 = vpop.f32.mrb[9].mxu0  ;;  %v488_v58 = vadd.f32 %v482_v50, %v440_v57 }
 0xe05   :  { %v485_v53 = vpop.f32.mrb[10].mxu0 }
 0xe06   :  { %497 = vrot.lane.b32.xlu0 %v495_v51, %s994_s3  ;;  %v887_v54 = vpop.f32.mrb[11].mxu0  ;;  %v814_v59 = vmul.f32 -1.442695, %v488_v58 }
 0xe08   :  { %942 = vpow2.f32 %v814_v59 }
 0xe12   :  { %v943_v60 = vpop.eup %942 }
 0xe13   :  { %v492_v61 = vadd.f32 1.0, %v943_v60 }
 0xe15   :  { %944 = vrcp.f32 %v492_v61 }
 0xe1f   :  { %v945_v62 = vpop.eup %944 }
 0xe78   :  { %v498_v63 = vpop.permute.xlu0 %497 }
 0xe79   :  { %v500_v3 = vmul.f32 %v945_v62, %v498_v63 }
 0xe7b   :  { %502 = vrot.lane.b32.xlu1 %v500_v3, %s994_s3 }
 0xeed   :  { %v503_v4 = vpop.permute.xlu1 %502 }
 0xeee   :  { %v505_v5 = vadd.f32 %v503_v4, %v440_v57 }
 0xef0   :  { %946 = vtanh.f32 %v505_v5 }
 0xefa   :  { %v947_v7 = vpop.eup %946 }
 0xefb   :  { %v507_v8 = vsub.f32 %v436_v47, %v947_v7 }
 0xefd   :  { %509 = vrot.lane.b32.xlu0 %v507_v8, %s996_s26  ;;  %v821_v8 = vld [vmem:[%s1197_s0 + $0xe] sm:$0x3]  ;;  %s997_s0 = smov [#allocation4]  }
 0xefe   :  { %s777_s13 = sshll.u32 %s997_s0, 4  ;;  %s778_s13 = int_to_ptr.vmem [resolvable:$true] %s777_s13 }
 0xeff   :  { %s966_s14 = scalar_lea.vmem %s778_s13, 64  ;;  %p971_p1 = scmp.lt.s32.totalorder %s778_s13, %s778_s13 }
 0xf00   :  { %p967_p0 = scmp.ne.s32.totalorder %s778_s13, %s966_s14  ;;  %p972_p2 = scmp.lt.s32.totalorder %s966_s14, %s966_s14 }
 0xf02   :  { %p973_p3 = por %p972_p2, %p971_p1 }
 0xf04   :  { %p974_p4 = pnand %p973_p3, %p967_p0 }
 0xf6f   :  { %v510_v9 = vpop.permute.xlu0 %509 }
 0xf70   :  { %v512_v10 = vmul.f32 %v945_v62, %v510_v9  ;;  %v682_v9 = vunpack.c.l.bf16 %v821_v8 }
 0xf72   :  { %514 = vrot.lane.b32.xlu1 %v512_v10, %s995_s1  ;;  %v683_v10 = vadd.f32 %v1070_v14, %v682_v9 }
 0xfe4   :  { %v515_v11 = vpop.permute.xlu1 %514 }
 0xfe5   :  { %v517_v12 = vadd.f32 %v947_v7, %v515_v11 }
 0xfe7   :  { %v522_v13 = vpack.c.bf16 %v517_v12, %v517_v12 }
 0xfe9   :  { %524 = vrot.lane.b32.xlu0 %v522_v13, %s994_s3 }
0x105b   :  { %v525_v15 = vpop.permute.xlu0 %524 }
0x105c   :  { %893 = vmatmul.mubr.msk.bf16.vlgmr.msra.gmra.mrb[8].mxu1 %vm108_vm2, %v525_v15 }
0x105d   :  { %905 = vmatpush3.bf16.msra.mxu1 %v1028_v1  ;;  %908 = vmatprep.mubr.msk.bf16.mxu1 %vm993_vm1, %v992_v0  ;;  %v520_v1 = vunpack.c.l.bf16 %v815_v21 }
0x105e   :  { %906 = vmatprep.subr.bf16.mxu1 %v992_v0 }
0x105f   :  { %v521_v22 = vadd.f32 %v1070_v14, %v520_v1 }
0x1061   :  { %907 = vmatpush3.bf16.msra.mxu1 %v1033_v2 }
0x112f   :  { %v563_v16 = vpop.f32.mrb[8].mxu1 }
0x1130   :  { %v576_v17 = vadd.f32 %v563_v16, %v1060_v6  ;;  %v894_v18 = vpop.f32.mrb[9].mxu1  ;;  %v569_v23 = vadd.f32 %v563_v16, %v521_v22 }
0x1131   :  { %v566_v19 = vpop.f32.mrb[10].mxu1 }
0x1132   :  { %578 = vrot.lane.b32.xlu1 %v576_v17, %s994_s3  ;;  %v895_v20 = vpop.f32.mrb[11].mxu1  ;;  %v817_v24 = vmul.f32 -1.442695, %v569_v23 }
0x1134   :  { %948 = vpow2.f32 %v817_v24 }
0x113e   :  { %v949_v0 = vpop.eup %948 }
0x113f   :  { %v573_v2 = vadd.f32 1.0, %v949_v0 }
0x1141   :  { %950 = vrcp.f32 %v573_v2 }
0x114b   :  { %v951_v25 = vpop.eup %950 }
0x11a4   :  { %v579_v26 = vpop.permute.xlu1 %578 }
0x11a5   :  { %v581_v27 = vmul.f32 %v951_v25, %v579_v26 }
0x11a7   :  { %583 = vrot.lane.b32.xlu0 %v581_v27, %s994_s3 }
0x1219   :  { %v584_v28 = vpop.permute.xlu0 %583 }
0x121a   :  { %v586_v29 = vadd.f32 %v584_v28, %v521_v22 }
0x121c   :  { %952 = vtanh.f32 %v586_v29 }
0x1226   :  { %v953_v30 = vpop.eup %952 }
0x1227   :  { %v588_v31 = vsub.f32 %v517_v12, %v953_v30 }
0x1229   :  { %590 = vrot.lane.b32.xlu1 %v588_v31, %s996_s26 }
0x129b   :  { %v591_v32 = vpop.permute.xlu1 %590 }
0x129c   :  { %v593_v33 = vmul.f32 %v951_v25, %v591_v32 }
0x129e   :  { %595 = vrot.lane.b32.xlu0 %v593_v33, %s995_s1 }
0x1310   :  { %v596_v34 = vpop.permute.xlu0 %595 }
0x1311   :  { %v598_v35 = vadd.f32 %v953_v30, %v596_v34 }
0x1313   :  { %v603_v36 = vpack.c.bf16 %v598_v35, %v598_v35 }
0x1315   :  { %605 = vrot.lane.b32.xlu1 %v603_v36, %s994_s3 }
0x1387   :  { %v606_v37 = vpop.permute.xlu1 %605 }
0x1388   :  { %901 = vmatmul.mubr.msk.bf16.vlgmr.msra.gmra.mrb[12].mxu0 %vm108_vm2, %v606_v37 }
0x145b   :  { %v644_v38 = vpop.f32.mrb[12].mxu0 }
0x145c   :  { %v657_v39 = vadd.f32 %v644_v38, %v1060_v6  ;;  %v902_v40 = vpop.f32.mrb[13].mxu0  ;;  %v650_v46 = vadd.f32 %v644_v38, %v602_v45 }
0x145d   :  { %v647_v41 = vpop.f32.mrb[14].mxu0 }
0x145e   :  { %659 = vrot.lane.b32.xlu0 %v657_v39, %s994_s3  ;;  %v903_v42 = vpop.f32.mrb[15].mxu0  ;;  %v820_v47 = vmul.f32 -1.442695, %v650_v46 }
0x1460   :  { %954 = vpow2.f32 %v820_v47 }
0x146a   :  { %v955_v48 = vpop.eup %954 }
0x146b   :  { %v654_v49 = vadd.f32 1.0, %v955_v48 }
0x146d   :  { %956 = vrcp.f32 %v654_v49 }
0x1477   :  { %v957_v50 = vpop.eup %956 }
0x14d0   :  { %v660_v51 = vpop.permute.xlu0 %659 }
0x14d1   :  { %v662_v52 = vmul.f32 %v957_v50, %v660_v51 }
0x14d3   :  { %664 = vrot.lane.b32.xlu1 %v662_v52, %s994_s3 }
0x1545   :  { %v665_v53 = vpop.permute.xlu1 %664 }
0x1546   :  { %v667_v54 = vadd.f32 %v665_v53, %v602_v45 }
0x1548   :  { %958 = vtanh.f32 %v667_v54 }
0x1552   :  { %v959_v55 = vpop.eup %958 }
0x1553   :  { %v669_v56 = vsub.f32 %v598_v35, %v959_v55 }
0x1555   :  { %671 = vrot.lane.b32.xlu0 %v669_v56, %s996_s26 }
0x15c7   :  { %v672_v57 = vpop.permute.xlu0 %671 }
0x15c8   :  { %v674_v58 = vmul.f32 %v957_v50, %v672_v57 }
0x15ca   :  { %676 = vrot.lane.b32.xlu1 %v674_v58, %s995_s1 }
0x163c   :  { %v677_v59 = vpop.permute.xlu1 %676 }
0x163d   :  { %v679_v60 = vadd.f32 %v959_v55, %v677_v59 }
0x163f   :  { %v684_v61 = vpack.c.bf16 %v679_v60, %v679_v60 }
0x1641   :  { %686 = vrot.lane.b32.xlu0 %v684_v61, %s994_s3 }
0x16b3   :  { %v687_v62 = vpop.permute.xlu0 %686 }
0x16b4   :  { %909 = vmatmul.mubr.msk.bf16.vlgmr.msra.gmra.mrb[12].mxu1 %vm108_vm2, %v687_v62 }
0x1787   :  { %v725_v63 = vpop.f32.mrb[12].mxu1 }
0x1788   :  { %v738_v3 = vadd.f32 %v725_v63, %v1060_v6  ;;  %v910_v4 = vpop.f32.mrb[13].mxu1  ;;  %v731_v11 = vadd.f32 %v725_v63, %v683_v10 }
0x1789   :  { %v728_v5 = vpop.f32.mrb[14].mxu1 }
0x178a   :  { %740 = vrot.lane.b32.xlu1 %v738_v3, %s994_s3  ;;  %v911_v7 = vpop.f32.mrb[15].mxu1  ;;  %v823_v12 = vmul.f32 -1.442695, %v731_v11 }
0x178c   :  { %960 = vpow2.f32 %v823_v12 }
0x1796   :  { %v961_v13 = vpop.eup %960 }
0x1797   :  { %v735_v15 = vadd.f32 1.0, %v961_v13 }
0x1799   :  { %962 = vrcp.f32 %v735_v15 }
0x17a3   :  { %v963_v16 = vpop.eup %962 }
0x17fc   :  { %v741_v6 = vpop.permute.xlu1 %740 }
0x17fd   :  { %v743_v17 = vmul.f32 %v963_v16, %v741_v6 }
0x17ff   :  { %745 = vrot.lane.b32.xlu0 %v743_v17, %s994_s3 }
0x1871   :  { %v746_v18 = vpop.permute.xlu0 %745 }
0x1872   :  { %v748_v19 = vadd.f32 %v746_v18, %v683_v10 }
0x1874   :  { %964 = vtanh.f32 %v748_v19 }
0x187e   :  { %v965_v20 = vpop.eup %964 }
0x187f   :  { %v750_v21 = vsub.f32 %v679_v60, %v965_v20 }
0x1881   :  { %752 = vrot.lane.b32.xlu1 %v750_v21, %s996_s26 }
0x18f3   :  { %v753_v1 = vpop.permute.xlu1 %752 }
0x18f4   :  { %v755_v14 = vmul.f32 %v963_v16, %v753_v1 }
0x18f6   :  { %757 = vrot.lane.b32.xlu0 %v755_v14, %s995_s1 }
0x1968   :  { %v758_v22 = vpop.permute.xlu0 %757 }
0x1969   :  { %v760_v23 = vadd.f32 %v965_v20, %v758_v22 }
0x196b   :  { %762 = vrot.lane.b32.xlu1 %v760_v23, %s994_s3 }
0x19dd   :  { %v763_v24 = vpop.permute.xlu1 %762 }
0x19de   :  { %766 = vst.msk [vmem:[#allocation2] sm:$0xf] %vm43_vm0, %v763_v24  ;;  %770 = vst.msk [vmem:[#allocation4] sm:$0xf] %vm43_vm0, %v763_v24 }
0x19df   :  { %977 = shalt.err (!%p974_p4)
}
0x19e0   :  { %s978_s17 = scalar_lea.hbm %s1201_s4, 64 }
0x19e1   :  { %p979_p5 = scmp.ne.s32.totalorder %s1201_s4, %s978_s17  ;;  %p982_p6 = scmp.lt.u32.totalorder %s978_s17, %s1201_s4 }
0x19e3   :  { %p984_p7 = pnand %p982_p6, %p979_p5 }
0x19e5   :  { %987 = shalt.err (!%p984_p7)
}
0x19e6   :  { %780 = dma.vmem_to_hbm [thread:$0]  %s778_s13, 64, %s1201_s4, [#allocation5]  }
0x19e7   :  { %990 = dma.done.wait [#allocation5], 64  }
0x19e8   :  { %991 = vsyncadd [#allocation5], 4294967232 }
0x19e9   :  { %784 = vsyncpa [#allocation5], 1 }

</bundles_post_ra>
